<compile_context>
chip_gen: v6e
topology: v6e:2x2x1
jax: 0.10.0
libtpu: 0.0.40
codegen_flags: <defaults>
</compile_context>

<pallas_src>
import functools

import jax
import jax.numpy as jnp
from jax.experimental import pallas as pl
from jax.experimental.pallas import tpu as pltpu


# ---------------------------------------------------------------------------
# Fused kernel: one grid step processes `bt` samples end to end.  All
# intermediate activations stay in VMEM / vregs.
#   x_ref : (bt*64, 256) bf16  conv1 im2col (rows = (sample, oh*8+ow),
#                              cols = (kh, kw, cin))
# ---------------------------------------------------------------------------
def _critic_fused_kernel(x_ref, w1_ref, b1_ref, w2_ref, b2_ref, w3_ref, b3_ref,
                         w4_ref, b4_ref, w5_ref, b5_ref, o_ref, *, bt):
    f32, bf16 = jnp.float32, jnp.bfloat16

    # ---- conv1: single K=256 MXU pass (no input cast, bf16 straight in). ----
    h1 = jnp.dot(x_ref[...], w1_ref[...], preferred_element_type=f32)
    h1 = jnp.maximum(h1 + b1_ref[...], 0.0)                   # (bt*64, 32) f32
    h1 = h1.reshape(bt, 8, 8, 32)                              # (b,h,w,c) NHWC

    # ---- conv2 im2col -> one (9*bt, 512) x (512, 64) matmul. ----------------
    # Flatten (w, c) into lanes once: (bt, 8, 256) with col = w*32 + c.
    h1f = jnp.concatenate([h1[:, :, w, :] for w in range(8)], axis=-1)
    feats = []
    for oh in range(3):
        for ow in range(3):
            # 4x4x32 receptive field; cols ordered (kh, kw, cin) to match w2.
            feats.append(jnp.concatenate(
                [h1f[:, 2 * oh + dh, 64 * ow:64 * ow + 128] for dh in range(4)],
                axis=-1))                                      # (bt, 512) f32
    feat2 = jnp.concatenate(feats, axis=0).astype(bf16)        # (9*bt, 512), row = p*bt + b
    h2 = jnp.dot(feat2, w2_ref[...], preferred_element_type=f32)
    h2 = jnp.maximum(h2 + b2_ref[...], 0.0)                    # (9*bt, 64) f32

    # ---- conv3: lane-concat the 9 position blocks -> one (bt,576)x(576,64). -
    feat3 = jnp.concatenate([h2[p * bt:(p + 1) * bt, :] for p in range(9)],
                            axis=-1).astype(bf16)              # (bt, 576), col = p*64 + c
    h3 = jnp.dot(feat3, w3_ref[...], preferred_element_type=f32)
    h3 = jnp.maximum(h3 + b3_ref[...], 0.0)                    # (bt, 64) == flatten()

    # ---- fc1 ----------------------------------------------------------------
    h4 = jnp.dot(h3.astype(bf16), w4_ref[...], preferred_element_type=f32)
    h4 = jnp.maximum(h4 + b4_ref[...], 0.0)                    # (bt, 256) f32

    # ---- fc2 (N=1): VPU multiply + lane reduction (no 1-wide MXU matmul). ---
    v = jnp.sum(h4 * w5_ref[...], axis=-1, keepdims=True)      # (bt, 1) f32
    o_ref[...] = (v + b5_ref[...]).astype(o_ref.dtype)         # (bt, 1)


# ---------------------------------------------------------------------------
# Wrapper-side layout plumbing (plain JAX, traced once per call):
#   * NCHW -> NHWC, conv1 im2col into a lane-dense (B*64, 256) bf16 matrix.
#   * Weights flattened to matmul form (bf16), biases to (1, N) f32.
# ---------------------------------------------------------------------------
def _prepare_inputs(params, x_nchw):
    f32, bf16 = jnp.float32, jnp.bfloat16
    x = jnp.transpose(x_nchw, (0, 2, 3, 1)).astype(f32)        # (B, 36, 36, 4)
    B, H, W, C = x.shape
    assert H == 36 and W == 36 and C == 4, (
        "fc1.in_features == 64 requires 36x36x4 inputs (36 -> 8 -> 3 -> 1)")

    # conv1 im2col: rows = 8x8 output positions, cols = (kh, kw, cin).
    taps = [x[:, kh:kh + 29:4, kw:kw + 29:4, :]                # each (B, 8, 8, 4)
            for kh in range(8) for kw in range(8)]
    xcol = jnp.stack(taps, axis=3).reshape(B * 64, 256).astype(bf16)

    w1 = params["w1"].reshape(8 * 8 * 4, 32).astype(bf16)      # (kh,kw,cin) rows
    w2 = params["w2"].reshape(4 * 4 * 32, 64).astype(bf16)
    w3 = params["w3"].reshape(3 * 3 * 64, 64).astype(bf16)
    w4 = params["w4"].astype(bf16)                             # (64, 256)
    b1 = params["b1"].reshape(1, 32).astype(f32)
    b2 = params["b2"].reshape(1, 64).astype(f32)
    b3 = params["b3"].reshape(1, 64).astype(f32)
    b4 = params["b4"].reshape(1, 256).astype(f32)
    w5 = params["w5"].reshape(1, 256).astype(f32)              # fc2 as VPU reduction
    b5 = params["b5"].reshape(1, 1).astype(f32)
    return xcol, (w1, b1, w2, b2, w3, b3, w4, b4, w5, b5)


def critic_forward(params, x_nchw, *, block_b=128):
    """Forward pass matching the PyTorch Critic, as a single fused Pallas kernel."""
    xcol, weights = _prepare_inputs(params, x_nchw)
    b = x_nchw.shape[0]

    # Batch tiling: one grid step for small batches; 128-sample tiles (multiple
    # grid steps -> megacore / v7x two-TensorCore sharding) for large batches.
    if b <= block_b:
        bt, bp = b, b
    else:
        bt = max(128, (block_b // 128) * 128)                  # keep tiles lane/sublane aligned
        bp = pl.cdiv(b, bt) * bt
    if bp != b:                                                # pad batch to a tile multiple
        xcol = jnp.pad(xcol, ((0, (bp - b) * 64), (0, 0)))

    def wspec(a):  # small weight / bias: single full-array VMEM block
        return pl.BlockSpec(a.shape, lambda i: (0, 0))

    cp = dict(dimension_semantics=("parallel",))
    if bt >= 64:
        # Large tiles: raise the scoped-VMEM ceiling (v5e default is 16 MiB).
        # ~18 MiB live at bt=128 -- well under v7x's 64 MiB physical VMEM.
        cp["vmem_limit_bytes"] = 48 * 1024 * 1024

    out = pl.pallas_call(
        functools.partial(_critic_fused_kernel, bt=bt),
        out_shape=jax.ShapeDtypeStruct((bp, 1), jnp.float32),
        grid=(bp // bt,),
        in_specs=[pl.BlockSpec((bt * 64, 256), lambda i: (i, 0))]
                 + [wspec(a) for a in weights],
        out_specs=pl.BlockSpec((bt, 1), lambda i: (i, 0)),
        compiler_params=pltpu.CompilerParams(**cp),
    )(xcol, *weights)
    return out[:b]


# ---------------------------------------------------------------------------
# Deterministic Kaiming-normal-like init (fan_out, relu), bias 0.
# Conv weights stored as (kh, kw, cin, cout); linear weights as (in, out).
# ---------------------------------------------------------------------------
def init_params(key):
    def kaiming(key, shape, fan_out):
        std = (2.0 / fan_out) ** 0.5
        return std * jax.random.normal(key, shape, dtype=jnp.float32)

    ks = jax.random.split(key, 5)
    return {
        "w1": kaiming(ks[0], (8, 8, 4, 32), fan_out=32 * 8 * 8),
        "b1": jnp.zeros((32,), jnp.float32),
        "w2": kaiming(ks[1], (4, 4, 32, 64), fan_out=64 * 4 * 4),
        "b2": jnp.zeros((64,), jnp.float32),
        "w3": kaiming(ks[2], (3, 3, 64, 64), fan_out=64 * 3 * 3),
        "b3": jnp.zeros((64,), jnp.float32),
        "w4": kaiming(ks[3], (64, 256), fan_out=256),
        "b4": jnp.zeros((256,), jnp.float32),
        "w5": kaiming(ks[4], (256, 1), fan_out=1),
        "b5": jnp.zeros((1,), jnp.float32),
    }


# Plain-JAX f32 reference (matches the PyTorch forward) for a sanity check.
def _reference_forward(params, x_nchw):
    x = x_nchw.astype(jnp.float32)

    def conv(x, w, b, stride):
        y = jax.lax.conv_general_dilated(
            x, w, window_strides=(stride, stride), padding="VALID",
            dimension_numbers=("NCHW", "HWIO", "NCHW"))
        return jax.nn.relu(y + b.reshape(1, -1, 1, 1))

    x = conv(x, params["w1"], params["b1"], 4)
    x = conv(x, params["w2"], params["b2"], 2)
    x = conv(x, params["w3"], params["b3"], 1)
    x = x.reshape(x.shape[0], -1)
    x = jax.nn.relu(x @ params["w4"] + params["b4"])
    return x @ params["w5"] + params["b5"]


if __name__ == "__main__":
    key = jax.random.PRNGKey(0)
    pkey, xkey = jax.random.split(key)
    params = init_params(pkey)

    # fc1 expects 64 flattened features => 36x36 input spatial size.
    B, C, H, W = 2, 4, 36, 36
    x = jax.random.normal(xkey, (B, C, H, W), dtype=jnp.float32)  # NCHW

    fwd = jax.jit(critic_forward)
    out = jax.block_until_ready(fwd(params, x))

    assert out.shape == (B, 1), out.shape
    assert out.dtype == jnp.float32

    # Numerical check against the f32 reference (loose tolerance: all matmuls
    # run on the bf16 MXU path with f32 accumulation).
    ref = jax.block_until_ready(_reference_forward(params, x))
    assert jnp.allclose(out, ref, rtol=1e-1, atol=1e-1), (out, ref)

    print("KERNEL_OK")
</pallas_src>

<mosaic_0001>
module attributes {stable_mosaic.version = 11 : i64} {
  func.func @_critic_fused_kernel(%arg0: i32, %arg1: memref<128x256xbf16, #tpu.memory_space<vmem>>, %arg2: memref<256x32xbf16, #tpu.memory_space<vmem>>, %arg3: memref<1x32xf32, #tpu.memory_space<vmem>>, %arg4: memref<512x64xbf16, #tpu.memory_space<vmem>>, %arg5: memref<1x64xf32, #tpu.memory_space<vmem>>, %arg6: memref<576x64xbf16, #tpu.memory_space<vmem>>, %arg7: memref<1x64xf32, #tpu.memory_space<vmem>>, %arg8: memref<64x256xbf16, #tpu.memory_space<vmem>>, %arg9: memref<1x256xf32, #tpu.memory_space<vmem>>, %arg10: memref<1x256xf32, #tpu.memory_space<vmem>>, %arg11: memref<1x1xf32, #tpu.memory_space<vmem>>, %arg12: memref<2x1xf32, #tpu.memory_space<vmem>>) attributes {dimension_semantics = [#tpu.dimension_semantics<parallel>], iteration_bounds = array<i64: 1>, scalar_prefetch = 0 : i64, scratch_operands = 0 : i64, tpu.core_type = #tpu.core_type<tc>, window_params = [{transform_indices = @transform_0, window_bounds = array<i64: 128, 256>}, {pipeline_mode = #tpu.pipeline_mode<synchronous>, transform_indices = @transform_1, window_bounds = array<i64: 256, 32>}, {pipeline_mode = #tpu.pipeline_mode<synchronous>, transform_indices = @transform_2, window_bounds = array<i64: 1, 32>}, {pipeline_mode = #tpu.pipeline_mode<synchronous>, transform_indices = @transform_3, window_bounds = array<i64: 512, 64>}, {pipeline_mode = #tpu.pipeline_mode<synchronous>, transform_indices = @transform_4, window_bounds = array<i64: 1, 64>}, {pipeline_mode = #tpu.pipeline_mode<synchronous>, transform_indices = @transform_5, window_bounds = array<i64: 576, 64>}, {pipeline_mode = #tpu.pipeline_mode<synchronous>, transform_indices = @transform_6, window_bounds = array<i64: 1, 64>}, {pipeline_mode = #tpu.pipeline_mode<synchronous>, transform_indices = @transform_7, window_bounds = array<i64: 64, 256>}, {pipeline_mode = #tpu.pipeline_mode<synchronous>, transform_indices = @transform_8, window_bounds = array<i64: 1, 256>}, {pipeline_mode = #tpu.pipeline_mode<synchronous>, transform_indices = @transform_9, window_bounds = array<i64: 1, 256>}, {pipeline_mode = #tpu.pipeline_mode<synchronous>, transform_indices = @transform_10, window_bounds = array<i64: 1, 1>}, {transform_indices = @transform_11, window_bounds = array<i64: 2, 1>}]} {
    %c0 = arith.constant 0 : index
    %c0_0 = arith.constant 0 : index
    %0 = vector.load %arg1[%c0, %c0_0] : memref<128x256xbf16, #tpu.memory_space<vmem>>, vector<128x256xbf16>
    %c0_1 = arith.constant 0 : index
    %c0_2 = arith.constant 0 : index
    %1 = vector.load %arg2[%c0_1, %c0_2] : memref<256x32xbf16, #tpu.memory_space<vmem>>, vector<256x32xbf16>
    %cst = arith.constant dense<0.000000e+00> : vector<128x32xf32>
    %2 = tpu.matmul %0, %1, %cst {dimension_numbers = #tpu.dot_dimension_numbers<[1], [0], [0], [1], [0, 0, 1, 1], [], []>} : vector<128x256xbf16>, vector<256x32xbf16>, vector<128x32xf32> -> vector<128x32xf32>
    %c0_3 = arith.constant 0 : index
    %c0_4 = arith.constant 0 : index
    %3 = vector.load %arg3[%c0_3, %c0_4] : memref<1x32xf32, #tpu.memory_space<vmem>>, vector<1x32xf32>
    %4 = vector.broadcast %3 : vector<1x32xf32> to vector<128x32xf32>
    %5 = arith.addf %2, %4 : vector<128x32xf32>
    %cst_5 = arith.constant 0.000000e+00 : f32
    %6 = vector.broadcast %cst_5 : f32 to vector<128x32xf32>
    %7 = arith.maximumf %5, %6 : vector<128x32xf32>
    %8 = vector.shape_cast %7 : vector<128x32xf32> to vector<2x8x8x32xf32>
    %9 = vector.extract_strided_slice %8 {offsets = [0, 0, 0, 0], sizes = [2, 8, 1, 32], strides = [1, 1, 1, 1]} : vector<2x8x8x32xf32> to vector<2x8x1x32xf32>
    %10 = vector.shape_cast %9 : vector<2x8x1x32xf32> to vector<2x8x32xf32>
    %11 = vector.extract_strided_slice %8 {offsets = [0, 0, 1, 0], sizes = [2, 8, 1, 32], strides = [1, 1, 1, 1]} : vector<2x8x8x32xf32> to vector<2x8x1x32xf32>
    %12 = vector.shape_cast %11 : vector<2x8x1x32xf32> to vector<2x8x32xf32>
    %13 = vector.extract_strided_slice %8 {offsets = [0, 0, 2, 0], sizes = [2, 8, 1, 32], strides = [1, 1, 1, 1]} : vector<2x8x8x32xf32> to vector<2x8x1x32xf32>
    %14 = vector.shape_cast %13 : vector<2x8x1x32xf32> to vector<2x8x32xf32>
    %15 = vector.extract_strided_slice %8 {offsets = [0, 0, 3, 0], sizes = [2, 8, 1, 32], strides = [1, 1, 1, 1]} : vector<2x8x8x32xf32> to vector<2x8x1x32xf32>
    %16 = vector.shape_cast %15 : vector<2x8x1x32xf32> to vector<2x8x32xf32>
    %17 = vector.extract_strided_slice %8 {offsets = [0, 0, 4, 0], sizes = [2, 8, 1, 32], strides = [1, 1, 1, 1]} : vector<2x8x8x32xf32> to vector<2x8x1x32xf32>
    %18 = vector.shape_cast %17 : vector<2x8x1x32xf32> to vector<2x8x32xf32>
    %19 = vector.extract_strided_slice %8 {offsets = [0, 0, 5, 0], sizes = [2, 8, 1, 32], strides = [1, 1, 1, 1]} : vector<2x8x8x32xf32> to vector<2x8x1x32xf32>
    %20 = vector.shape_cast %19 : vector<2x8x1x32xf32> to vector<2x8x32xf32>
    %21 = vector.extract_strided_slice %8 {offsets = [0, 0, 6, 0], sizes = [2, 8, 1, 32], strides = [1, 1, 1, 1]} : vector<2x8x8x32xf32> to vector<2x8x1x32xf32>
    %22 = vector.shape_cast %21 : vector<2x8x1x32xf32> to vector<2x8x32xf32>
    %23 = vector.extract_strided_slice %8 {offsets = [0, 0, 7, 0], sizes = [2, 8, 1, 32], strides = [1, 1, 1, 1]} : vector<2x8x8x32xf32> to vector<2x8x1x32xf32>
    %24 = vector.shape_cast %23 : vector<2x8x1x32xf32> to vector<2x8x32xf32>
    %25 = tpu.concatenate %10, %12, %14, %16, %18, %20, %22, %24 in 2 : vector<2x8x32xf32>, vector<2x8x32xf32>, vector<2x8x32xf32>, vector<2x8x32xf32>, vector<2x8x32xf32>, vector<2x8x32xf32>, vector<2x8x32xf32>, vector<2x8x32xf32> -> vector<2x8x256xf32>
    %26 = vector.extract_strided_slice %25 {offsets = [0, 0, 0], sizes = [2, 1, 128], strides = [1, 1, 1]} : vector<2x8x256xf32> to vector<2x1x128xf32>
    %27 = vector.shape_cast %26 : vector<2x1x128xf32> to vector<2x128xf32>
    %28 = vector.extract_strided_slice %25 {offsets = [0, 1, 0], sizes = [2, 1, 128], strides = [1, 1, 1]} : vector<2x8x256xf32> to vector<2x1x128xf32>
    %29 = vector.shape_cast %28 : vector<2x1x128xf32> to vector<2x128xf32>
    %30 = vector.extract_strided_slice %25 {offsets = [0, 2, 0], sizes = [2, 1, 128], strides = [1, 1, 1]} : vector<2x8x256xf32> to vector<2x1x128xf32>
    %31 = vector.shape_cast %30 : vector<2x1x128xf32> to vector<2x128xf32>
    %32 = vector.extract_strided_slice %25 {offsets = [0, 3, 0], sizes = [2, 1, 128], strides = [1, 1, 1]} : vector<2x8x256xf32> to vector<2x1x128xf32>
    %33 = vector.shape_cast %32 : vector<2x1x128xf32> to vector<2x128xf32>
    %34 = tpu.concatenate %27, %29, %31, %33 in 1 : vector<2x128xf32>, vector<2x128xf32>, vector<2x128xf32>, vector<2x128xf32> -> vector<2x512xf32>
    %35 = vector.extract_strided_slice %25 {offsets = [0, 0, 64], sizes = [2, 1, 128], strides = [1, 1, 1]} : vector<2x8x256xf32> to vector<2x1x128xf32>
    %36 = vector.shape_cast %35 : vector<2x1x128xf32> to vector<2x128xf32>
    %37 = vector.extract_strided_slice %25 {offsets = [0, 1, 64], sizes = [2, 1, 128], strides = [1, 1, 1]} : vector<2x8x256xf32> to vector<2x1x128xf32>
    %38 = vector.shape_cast %37 : vector<2x1x128xf32> to vector<2x128xf32>
    %39 = vector.extract_strided_slice %25 {offsets = [0, 2, 64], sizes = [2, 1, 128], strides = [1, 1, 1]} : vector<2x8x256xf32> to vector<2x1x128xf32>
    %40 = vector.shape_cast %39 : vector<2x1x128xf32> to vector<2x128xf32>
    %41 = vector.extract_strided_slice %25 {offsets = [0, 3, 64], sizes = [2, 1, 128], strides = [1, 1, 1]} : vector<2x8x256xf32> to vector<2x1x128xf32>
    %42 = vector.shape_cast %41 : vector<2x1x128xf32> to vector<2x128xf32>
    %43 = tpu.concatenate %36, %38, %40, %42 in 1 : vector<2x128xf32>, vector<2x128xf32>, vector<2x128xf32>, vector<2x128xf32> -> vector<2x512xf32>
    %44 = vector.extract_strided_slice %25 {offsets = [0, 0, 128], sizes = [2, 1, 128], strides = [1, 1, 1]} : vector<2x8x256xf32> to vector<2x1x128xf32>
    %45 = vector.shape_cast %44 : vector<2x1x128xf32> to vector<2x128xf32>
    %46 = vector.extract_strided_slice %25 {offsets = [0, 1, 128], sizes = [2, 1, 128], strides = [1, 1, 1]} : vector<2x8x256xf32> to vector<2x1x128xf32>
    %47 = vector.shape_cast %46 : vector<2x1x128xf32> to vector<2x128xf32>
    %48 = vector.extract_strided_slice %25 {offsets = [0, 2, 128], sizes = [2, 1, 128], strides = [1, 1, 1]} : vector<2x8x256xf32> to vector<2x1x128xf32>
    %49 = vector.shape_cast %48 : vector<2x1x128xf32> to vector<2x128xf32>
    %50 = vector.extract_strided_slice %25 {offsets = [0, 3, 128], sizes = [2, 1, 128], strides = [1, 1, 1]} : vector<2x8x256xf32> to vector<2x1x128xf32>
    %51 = vector.shape_cast %50 : vector<2x1x128xf32> to vector<2x128xf32>
    %52 = tpu.concatenate %45, %47, %49, %51 in 1 : vector<2x128xf32>, vector<2x128xf32>, vector<2x128xf32>, vector<2x128xf32> -> vector<2x512xf32>
    %53 = vector.extract_strided_slice %25 {offsets = [0, 2, 0], sizes = [2, 1, 128], strides = [1, 1, 1]} : vector<2x8x256xf32> to vector<2x1x128xf32>
    %54 = vector.shape_cast %53 : vector<2x1x128xf32> to vector<2x128xf32>
    %55 = vector.extract_strided_slice %25 {offsets = [0, 3, 0], sizes = [2, 1, 128], strides = [1, 1, 1]} : vector<2x8x256xf32> to vector<2x1x128xf32>
    %56 = vector.shape_cast %55 : vector<2x1x128xf32> to vector<2x128xf32>
    %57 = vector.extract_strided_slice %25 {offsets = [0, 4, 0], sizes = [2, 1, 128], strides = [1, 1, 1]} : vector<2x8x256xf32> to vector<2x1x128xf32>
    %58 = vector.shape_cast %57 : vector<2x1x128xf32> to vector<2x128xf32>
    %59 = vector.extract_strided_slice %25 {offsets = [0, 5, 0], sizes = [2, 1, 128], strides = [1, 1, 1]} : vector<2x8x256xf32> to vector<2x1x128xf32>
    %60 = vector.shape_cast %59 : vector<2x1x128xf32> to vector<2x128xf32>
    %61 = tpu.concatenate %54, %56, %58, %60 in 1 : vector<2x128xf32>, vector<2x128xf32>, vector<2x128xf32>, vector<2x128xf32> -> vector<2x512xf32>
    %62 = vector.extract_strided_slice %25 {offsets = [0, 2, 64], sizes = [2, 1, 128], strides = [1, 1, 1]} : vector<2x8x256xf32> to vector<2x1x128xf32>
    %63 = vector.shape_cast %62 : vector<2x1x128xf32> to vector<2x128xf32>
    %64 = vector.extract_strided_slice %25 {offsets = [0, 3, 64], sizes = [2, 1, 128], strides = [1, 1, 1]} : vector<2x8x256xf32> to vector<2x1x128xf32>
    %65 = vector.shape_cast %64 : vector<2x1x128xf32> to vector<2x128xf32>
    %66 = vector.extract_strided_slice %25 {offsets = [0, 4, 64], sizes = [2, 1, 128], strides = [1, 1, 1]} : vector<2x8x256xf32> to vector<2x1x128xf32>
    %67 = vector.shape_cast %66 : vector<2x1x128xf32> to vector<2x128xf32>
    %68 = vector.extract_strided_slice %25 {offsets = [0, 5, 64], sizes = [2, 1, 128], strides = [1, 1, 1]} : vector<2x8x256xf32> to vector<2x1x128xf32>
    %69 = vector.shape_cast %68 : vector<2x1x128xf32> to vector<2x128xf32>
    %70 = tpu.concatenate %63, %65, %67, %69 in 1 : vector<2x128xf32>, vector<2x128xf32>, vector<2x128xf32>, vector<2x128xf32> -> vector<2x512xf32>
    %71 = vector.extract_strided_slice %25 {offsets = [0, 2, 128], sizes = [2, 1, 128], strides = [1, 1, 1]} : vector<2x8x256xf32> to vector<2x1x128xf32>
    %72 = vector.shape_cast %71 : vector<2x1x128xf32> to vector<2x128xf32>
    %73 = vector.extract_strided_slice %25 {offsets = [0, 3, 128], sizes = [2, 1, 128], strides = [1, 1, 1]} : vector<2x8x256xf32> to vector<2x1x128xf32>
    %74 = vector.shape_cast %73 : vector<2x1x128xf32> to vector<2x128xf32>
    %75 = vector.extract_strided_slice %25 {offsets = [0, 4, 128], sizes = [2, 1, 128], strides = [1, 1, 1]} : vector<2x8x256xf32> to vector<2x1x128xf32>
    %76 = vector.shape_cast %75 : vector<2x1x128xf32> to vector<2x128xf32>
    %77 = vector.extract_strided_slice %25 {offsets = [0, 5, 128], sizes = [2, 1, 128], strides = [1, 1, 1]} : vector<2x8x256xf32> to vector<2x1x128xf32>
    %78 = vector.shape_cast %77 : vector<2x1x128xf32> to vector<2x128xf32>
    %79 = tpu.concatenate %72, %74, %76, %78 in 1 : vector<2x128xf32>, vector<2x128xf32>, vector<2x128xf32>, vector<2x128xf32> -> vector<2x512xf32>
    %80 = vector.extract_strided_slice %25 {offsets = [0, 4, 0], sizes = [2, 1, 128], strides = [1, 1, 1]} : vector<2x8x256xf32> to vector<2x1x128xf32>
    %81 = vector.shape_cast %80 : vector<2x1x128xf32> to vector<2x128xf32>
    %82 = vector.extract_strided_slice %25 {offsets = [0, 5, 0], sizes = [2, 1, 128], strides = [1, 1, 1]} : vector<2x8x256xf32> to vector<2x1x128xf32>
    %83 = vector.shape_cast %82 : vector<2x1x128xf32> to vector<2x128xf32>
    %84 = vector.extract_strided_slice %25 {offsets = [0, 6, 0], sizes = [2, 1, 128], strides = [1, 1, 1]} : vector<2x8x256xf32> to vector<2x1x128xf32>
    %85 = vector.shape_cast %84 : vector<2x1x128xf32> to vector<2x128xf32>
    %86 = vector.extract_strided_slice %25 {offsets = [0, 7, 0], sizes = [2, 1, 128], strides = [1, 1, 1]} : vector<2x8x256xf32> to vector<2x1x128xf32>
    %87 = vector.shape_cast %86 : vector<2x1x128xf32> to vector<2x128xf32>
    %88 = tpu.concatenate %81, %83, %85, %87 in 1 : vector<2x128xf32>, vector<2x128xf32>, vector<2x128xf32>, vector<2x128xf32> -> vector<2x512xf32>
    %89 = vector.extract_strided_slice %25 {offsets = [0, 4, 64], sizes = [2, 1, 128], strides = [1, 1, 1]} : vector<2x8x256xf32> to vector<2x1x128xf32>
    %90 = vector.shape_cast %89 : vector<2x1x128xf32> to vector<2x128xf32>
    %91 = vector.extract_strided_slice %25 {offsets = [0, 5, 64], sizes = [2, 1, 128], strides = [1, 1, 1]} : vector<2x8x256xf32> to vector<2x1x128xf32>
    %92 = vector.shape_cast %91 : vector<2x1x128xf32> to vector<2x128xf32>
    %93 = vector.extract_strided_slice %25 {offsets = [0, 6, 64], sizes = [2, 1, 128], strides = [1, 1, 1]} : vector<2x8x256xf32> to vector<2x1x128xf32>
    %94 = vector.shape_cast %93 : vector<2x1x128xf32> to vector<2x128xf32>
    %95 = vector.extract_strided_slice %25 {offsets = [0, 7, 64], sizes = [2, 1, 128], strides = [1, 1, 1]} : vector<2x8x256xf32> to vector<2x1x128xf32>
    %96 = vector.shape_cast %95 : vector<2x1x128xf32> to vector<2x128xf32>
    %97 = tpu.concatenate %90, %92, %94, %96 in 1 : vector<2x128xf32>, vector<2x128xf32>, vector<2x128xf32>, vector<2x128xf32> -> vector<2x512xf32>
    %98 = vector.extract_strided_slice %25 {offsets = [0, 4, 128], sizes = [2, 1, 128], strides = [1, 1, 1]} : vector<2x8x256xf32> to vector<2x1x128xf32>
    %99 = vector.shape_cast %98 : vector<2x1x128xf32> to vector<2x128xf32>
    %100 = vector.extract_strided_slice %25 {offsets = [0, 5, 128], sizes = [2, 1, 128], strides = [1, 1, 1]} : vector<2x8x256xf32> to vector<2x1x128xf32>
    %101 = vector.shape_cast %100 : vector<2x1x128xf32> to vector<2x128xf32>
    %102 = vector.extract_strided_slice %25 {offsets = [0, 6, 128], sizes = [2, 1, 128], strides = [1, 1, 1]} : vector<2x8x256xf32> to vector<2x1x128xf32>
    %103 = vector.shape_cast %102 : vector<2x1x128xf32> to vector<2x128xf32>
    %104 = vector.extract_strided_slice %25 {offsets = [0, 7, 128], sizes = [2, 1, 128], strides = [1, 1, 1]} : vector<2x8x256xf32> to vector<2x1x128xf32>
    %105 = vector.shape_cast %104 : vector<2x1x128xf32> to vector<2x128xf32>
    %106 = tpu.concatenate %99, %101, %103, %105 in 1 : vector<2x128xf32>, vector<2x128xf32>, vector<2x128xf32>, vector<2x128xf32> -> vector<2x512xf32>
    %107 = tpu.concatenate %34, %43, %52, %61, %70, %79, %88, %97, %106 in 0 : vector<2x512xf32>, vector<2x512xf32>, vector<2x512xf32>, vector<2x512xf32>, vector<2x512xf32>, vector<2x512xf32>, vector<2x512xf32>, vector<2x512xf32>, vector<2x512xf32> -> vector<18x512xf32>
    %108 = arith.truncf %107 : vector<18x512xf32> to vector<18x512xbf16>
    %c0_6 = arith.constant 0 : index
    %c0_7 = arith.constant 0 : index
    %109 = vector.load %arg4[%c0_6, %c0_7] : memref<512x64xbf16, #tpu.memory_space<vmem>>, vector<512x64xbf16>
    %cst_8 = arith.constant dense<0.000000e+00> : vector<18x64xf32>
    %110 = tpu.matmul %108, %109, %cst_8 {dimension_numbers = #tpu.dot_dimension_numbers<[1], [0], [0], [1], [0, 0, 1, 1], [], []>} : vector<18x512xbf16>, vector<512x64xbf16>, vector<18x64xf32> -> vector<18x64xf32>
    %c0_9 = arith.constant 0 : index
    %c0_10 = arith.constant 0 : index
    %111 = vector.load %arg5[%c0_9, %c0_10] : memref<1x64xf32, #tpu.memory_space<vmem>>, vector<1x64xf32>
    %112 = vector.broadcast %111 : vector<1x64xf32> to vector<18x64xf32>
    %113 = arith.addf %110, %112 : vector<18x64xf32>
    %cst_11 = arith.constant 0.000000e+00 : f32
    %114 = vector.broadcast %cst_11 : f32 to vector<18x64xf32>
    %115 = arith.maximumf %113, %114 : vector<18x64xf32>
    %116 = vector.extract_strided_slice %115 {offsets = [0, 0], sizes = [2, 64], strides = [1, 1]} : vector<18x64xf32> to vector<2x64xf32>
    %117 = vector.extract_strided_slice %115 {offsets = [2, 0], sizes = [2, 64], strides = [1, 1]} : vector<18x64xf32> to vector<2x64xf32>
    %118 = vector.extract_strided_slice %115 {offsets = [4, 0], sizes = [2, 64], strides = [1, 1]} : vector<18x64xf32> to vector<2x64xf32>
    %119 = vector.extract_strided_slice %115 {offsets = [6, 0], sizes = [2, 64], strides = [1, 1]} : vector<18x64xf32> to vector<2x64xf32>
    %120 = vector.extract_strided_slice %115 {offsets = [8, 0], sizes = [2, 64], strides = [1, 1]} : vector<18x64xf32> to vector<2x64xf32>
    %121 = vector.extract_strided_slice %115 {offsets = [10, 0], sizes = [2, 64], strides = [1, 1]} : vector<18x64xf32> to vector<2x64xf32>
    %122 = vector.extract_strided_slice %115 {offsets = [12, 0], sizes = [2, 64], strides = [1, 1]} : vector<18x64xf32> to vector<2x64xf32>
    %123 = vector.extract_strided_slice %115 {offsets = [14, 0], sizes = [2, 64], strides = [1, 1]} : vector<18x64xf32> to vector<2x64xf32>
    %124 = vector.extract_strided_slice %115 {offsets = [16, 0], sizes = [2, 64], strides = [1, 1]} : vector<18x64xf32> to vector<2x64xf32>
    %125 = tpu.concatenate %116, %117, %118, %119, %120, %121, %122, %123, %124 in 1 : vector<2x64xf32>, vector<2x64xf32>, vector<2x64xf32>, vector<2x64xf32>, vector<2x64xf32>, vector<2x64xf32>, vector<2x64xf32>, vector<2x64xf32>, vector<2x64xf32> -> vector<2x576xf32>
    %126 = arith.truncf %125 : vector<2x576xf32> to vector<2x576xbf16>
    %c0_12 = arith.constant 0 : index
    %c0_13 = arith.constant 0 : index
    %127 = vector.load %arg6[%c0_12, %c0_13] : memref<576x64xbf16, #tpu.memory_space<vmem>>, vector<576x64xbf16>
    %cst_14 = arith.constant dense<0.000000e+00> : vector<2x64xf32>
    %128 = tpu.matmul %126, %127, %cst_14 {dimension_numbers = #tpu.dot_dimension_numbers<[1], [0], [0], [1], [0, 0, 1, 1], [], []>} : vector<2x576xbf16>, vector<576x64xbf16>, vector<2x64xf32> -> vector<2x64xf32>
    %c0_15 = arith.constant 0 : index
    %c0_16 = arith.constant 0 : index
    %129 = vector.load %arg7[%c0_15, %c0_16] : memref<1x64xf32, #tpu.memory_space<vmem>>, vector<1x64xf32>
    %130 = vector.broadcast %129 : vector<1x64xf32> to vector<2x64xf32>
    %131 = arith.addf %128, %130 : vector<2x64xf32>
    %cst_17 = arith.constant 0.000000e+00 : f32
    %132 = vector.broadcast %cst_17 : f32 to vector<2x64xf32>
    %133 = arith.maximumf %131, %132 : vector<2x64xf32>
    %134 = arith.truncf %133 : vector<2x64xf32> to vector<2x64xbf16>
    %c0_18 = arith.constant 0 : index
    %c0_19 = arith.constant 0 : index
    %135 = vector.load %arg8[%c0_18, %c0_19] : memref<64x256xbf16, #tpu.memory_space<vmem>>, vector<64x256xbf16>
    %cst_20 = arith.constant dense<0.000000e+00> : vector<2x256xf32>
    %136 = tpu.matmul %134, %135, %cst_20 {dimension_numbers = #tpu.dot_dimension_numbers<[1], [0], [0], [1], [0, 0, 1, 1], [], []>} : vector<2x64xbf16>, vector<64x256xbf16>, vector<2x256xf32> -> vector<2x256xf32>
    %c0_21 = arith.constant 0 : index
    %c0_22 = arith.constant 0 : index
    %137 = vector.load %arg9[%c0_21, %c0_22] : memref<1x256xf32, #tpu.memory_space<vmem>>, vector<1x256xf32>
    %138 = vector.broadcast %137 : vector<1x256xf32> to vector<2x256xf32>
    %139 = arith.addf %136, %138 : vector<2x256xf32>
    %cst_23 = arith.constant 0.000000e+00 : f32
    %140 = vector.broadcast %cst_23 : f32 to vector<2x256xf32>
    %141 = arith.maximumf %139, %140 : vector<2x256xf32>
    %c0_24 = arith.constant 0 : index
    %c0_25 = arith.constant 0 : index
    %142 = vector.load %arg10[%c0_24, %c0_25] : memref<1x256xf32, #tpu.memory_space<vmem>>, vector<1x256xf32>
    %143 = vector.broadcast %142 : vector<1x256xf32> to vector<2x256xf32>
    %144 = arith.mulf %141, %143 : vector<2x256xf32>
    %cst_26 = arith.constant dense<0.000000e+00> : vector<2xf32>
    %145 = vector.multi_reduction <add>, %144, %cst_26 [1] : vector<2x256xf32> to vector<2xf32>
    %146 = vector.shape_cast %145 : vector<2xf32> to vector<2x1xf32>
    %c0_27 = arith.constant 0 : index
    %c0_28 = arith.constant 0 : index
    %147 = vector.load %arg11[%c0_27, %c0_28] : memref<1x1xf32, #tpu.memory_space<vmem>>, vector<1x1xf32>
    %148 = vector.broadcast %147 : vector<1x1xf32> to vector<2x1xf32>
    %149 = arith.addf %146, %148 : vector<2x1xf32>
    %c0_29 = arith.constant 0 : index
    %c0_30 = arith.constant 0 : index
    %150 = vector.load %arg12[%c0_29, %c0_30] : memref<2x1xf32, #tpu.memory_space<vmem>>, vector<2x1xf32>
    tpu.vector_store %arg12[%c0_29, %c0_30], %149 {strides = array<i32>} : memref<2x1xf32, #tpu.memory_space<vmem>>, vector<2x1xf32>,
    return
  }
  func.func @transform_0(%arg0: i32) -> (i32, i32) {
    %c0_i32 = arith.constant 0 : i32
    %c0_i32_0 = arith.constant 0 : i32
    return %arg0, %c0_i32 : i32, i32
  }
  func.func @transform_1(%arg0: i32) -> (i32, i32) {
    %c0_i32 = arith.constant 0 : i32
    %c0_i32_0 = arith.constant 0 : i32
    %c0_i32_1 = arith.constant 0 : i32
    return %c0_i32, %c0_i32_0 : i32, i32
  }
  func.func @transform_2(%arg0: i32) -> (i32, i32) {
    %c0_i32 = arith.constant 0 : i32
    %c0_i32_0 = arith.constant 0 : i32
    %c0_i32_1 = arith.constant 0 : i32
    return %c0_i32, %c0_i32_0 : i32, i32
  }
  func.func @transform_3(%arg0: i32) -> (i32, i32) {
    %c0_i32 = arith.constant 0 : i32
    %c0_i32_0 = arith.constant 0 : i32
    %c0_i32_1 = arith.constant 0 : i32
    return %c0_i32, %c0_i32_0 : i32, i32
  }
  func.func @transform_4(%arg0: i32) -> (i32, i32) {
    %c0_i32 = arith.constant 0 : i32
    %c0_i32_0 = arith.constant 0 : i32
    %c0_i32_1 = arith.constant 0 : i32
    return %c0_i32, %c0_i32_0 : i32, i32
  }
  func.func @transform_5(%arg0: i32) -> (i32, i32) {
    %c0_i32 = arith.constant 0 : i32
    %c0_i32_0 = arith.constant 0 : i32
    %c0_i32_1 = arith.constant 0 : i32
    return %c0_i32, %c0_i32_0 : i32, i32
  }
  func.func @transform_6(%arg0: i32) -> (i32, i32) {
    %c0_i32 = arith.constant 0 : i32
    %c0_i32_0 = arith.constant 0 : i32
    %c0_i32_1 = arith.constant 0 : i32
    return %c0_i32, %c0_i32_0 : i32, i32
  }
  func.func @transform_7(%arg0: i32) -> (i32, i32) {
    %c0_i32 = arith.constant 0 : i32
    %c0_i32_0 = arith.constant 0 : i32
    %c0_i32_1 = arith.constant 0 : i32
    return %c0_i32, %c0_i32_0 : i32, i32
  }
  func.func @transform_8(%arg0: i32) -> (i32, i32) {
    %c0_i32 = arith.constant 0 : i32
    %c0_i32_0 = arith.constant 0 : i32
    %c0_i32_1 = arith.constant 0 : i32
    return %c0_i32, %c0_i32_0 : i32, i32
  }
  func.func @transform_9(%arg0: i32) -> (i32, i32) {
    %c0_i32 = arith.constant 0 : i32
    %c0_i32_0 = arith.constant 0 : i32
    %c0_i32_1 = arith.constant 0 : i32
    return %c0_i32, %c0_i32_0 : i32, i32
  }
  func.func @transform_10(%arg0: i32) -> (i32, i32) {
    %c0_i32 = arith.constant 0 : i32
    %c0_i32_0 = arith.constant 0 : i32
    %c0_i32_1 = arith.constant 0 : i32
    return %c0_i32, %c0_i32_0 : i32, i32
  }
  func.func @transform_11(%arg0: i32) -> (i32, i32) {
    %c0_i32 = arith.constant 0 : i32
    %c0_i32_0 = arith.constant 0 : i32
    return %arg0, %c0_i32 : i32, i32
  }
}

</mosaic_0001>

<bundles_post_ra>
// kernel: critic_forward.1
= control target key start
LH: loop header
LB: loop body
LE: loop exit
PB: predicated region body
PF: predicated region fallthrough
CT: control target
= control target key end

     0   :  { %vm402_vm0 = vcmask 1041409   ;;  %vm405_vm1 = vcmask 1042434   ;;  %vm408_vm2 = vcmask 1043459   ;;  %vm411_vm3 = vcmask 1044484   ;;  %s2357_s24 = smov 96   ;;  %s3265_s1 = inlined_call_operand.vmem [shape: bf16[256,32], index: 1, kind: input, shape index: {}]   ;;  %s3266_s0 = inlined_call_operand.vmem [shape: bf16[128,256], index: 0, kind: input, shape index: {}]   ;;  %s3267_s2 = inlined_call_operand.vmem [shape: f32[1,32], index: 2, kind: input, shape index: {}]   ;;  %s3268_s3 = inlined_call_operand.vmem [shape: bf16[512,64], index: 3, kind: input, shape index: {}]   ;;  %s3269_s5 = inlined_call_operand.vmem [shape: bf16[576,64], index: 5, kind: input, shape index: {}]   ;;  %s3270_s4 = inlined_call_operand.vmem [shape: f32[1,64], index: 4, kind: input, shape index: {}]   ;;  %s3271_s7 = inlined_call_operand.vmem [shape: bf16[64,256], index: 7, kind: input, shape index: {}]   ;;  %s3272_s6 = inlined_call_operand.vmem [shape: f32[1,64], index: 6, kind: input, shape index: {}]   ;;  %s3273_s10 = inlined_call_operand.<no memory space> [shape: f32[1,1], index: 10, kind: input, shape index: {}]   ;;  %s3274_s8 = inlined_call_operand.vmem [shape: f32[1,256], index: 8, kind: input, shape index: {}]   ;;  %s3275_s9 = inlined_call_operand.vmem [shape: f32[1,256], index: 9, kind: input, shape index: {}]   ;;  %s3276_s11 = inlined_call_operand.vmem [shape: f32[2,1], index: 11, kind: output, shape index: {}]  }
   0x1   :  { %v2235_v0 = vld [vmem:[%s3265_s1 + $0x78] sm:$0xff]   ;;  %v2237_v2 = vld [vmem:[%s3265_s1 + $0x70] sm:$0xff]   ;;  %v2239_v4 = vld [vmem:[%s3265_s1 + $0x68] sm:$0xff]   ;;  %vm414_vm4 = vcmask 1045509   ;;  %vm417_vm5 = vcmask 1046534   ;;  %vm420_vm6 = vcmask 1047559  }
   0x2   :  { %v2236_v1 = vld [vmem:[%s3265_s1 + $0x38] sm:$0xff]   ;;  %1948 = vmatprep.subr.bf16.mxu0 %v2235_v0  ;;  %v2238_v3 = vld [vmem:[%s3265_s1 + $0x30] sm:$0xff]   ;;  %v2240_v5 = vld [vmem:[%s3265_s1 + $0x28] sm:$0xff]   ;;  %vm672_vm7 = vcmask 261120   ;;  %vm675_vm8 = vcmask 523264   ;;  %vm678_vm9 = vcmask 785408  }
   0x3   :  { %1949 = vmatpush3.bf16.msra.mxu0 %v2236_v1  ;;  %v2241_v6 = vld [vmem:[%s3265_s1 + $0x60] sm:$0xff]   ;;  %v2243_v8 = vld [vmem:[%s3265_s1 + $0x58] sm:$0xff]   ;;  %v2245_v10 = vld [vmem:[%s3265_s1 + $0x50] sm:$0xff]   ;;  %vm847_vm10 = vcmask 1041408   ;;  %vm852_vm11 = vcmask 1043456   ;;  %vm857_vm12 = vcmask 1045504  }
   0x4   :  { %1950 = vmatprep.subr.bf16.mxu0 %v2237_v2  ;;  %v2242_v7 = vld [vmem:[%s3265_s1 + $0x20] sm:$0xff]   ;;  %v2244_v9 = vld [vmem:[%s3265_s1 + $0x18] sm:$0xff]   ;;  %v2246_v12 = vld [vmem:[%s3265_s1 + $0x10] sm:$0xff]   ;;  %vm2359_vm13 = vmmov 0   ;;  %vm1828_vm14 = vcmask 1024  }
   0x5   :  { %v2253_v11 = vld [vmem:[%s3266_s0 + $0x4] ss:$8 sps:$4 sm:$0xff]   ;;  %v2251_v17 = vld [vmem:[%s3266_s0] ss:$8 sps:$4 sm:$0xff]   ;;  %v2254_v18 = vld [vmem:[%s3266_s0 + $0x14] ss:$8 sps:$4 sm:$0xff]  }
   0x6   :  { %304 = vmatprep.mubr.bf16.mxu0 %v2253_v11  ;;  %v2247_v13 = vld [vmem:[%s3265_s1 + $0x48] sm:$0xff]   ;;  %v2249_v15 = vld [vmem:[%s3265_s1 + $0x40] sm:$0xff]   ;;  %v2256_v19 = vld [vmem:[%s3266_s0 + $0x10] ss:$8 sps:$4 sm:$0xff]  }
   0x7   :  { %1951 = vmatpush3.bf16.msra.mxu0 %v2238_v3  ;;  %v2248_v14 = vld [vmem:[%s3265_s1 + $0x8] sm:$0xff]   ;;  %v2250_v16 = vld [vmem:[%s3265_s1] sm:$0xff]   ;;  %v2260_v22 = vld [vmem:[%s3266_s0 + $0x34] ss:$8 sps:$4 sm:$0xff]  }
   0x8   :  { %1952 = vmatprep.subr.bf16.mxu0 %v2239_v4  ;;  %v2257_v20 = vld [vmem:[%s3266_s0 + $0x24] ss:$8 sps:$4 sm:$0xff]   ;;  %v2259_v21 = vld [vmem:[%s3266_s0 + $0x20] ss:$8 sps:$4 sm:$0xff]   ;;  %v2262_v23 = vld [vmem:[%s3266_s0 + $0x30] ss:$8 sps:$4 sm:$0xff]  }
   0x9   :  { %v2263_v24 = vld [vmem:[%s3266_s0 + $0x44] ss:$8 sps:$4 sm:$0xff]   ;;  %v2265_v25 = vld [vmem:[%s3266_s0 + $0x40] ss:$8 sps:$4 sm:$0xff]   ;;  %v2266_v26 = vld [vmem:[%s3266_s0 + $0x54] ss:$8 sps:$4 sm:$0xff]  }
   0xa   :  { %v2268_v27 = vld [vmem:[%s3266_s0 + $0x50] ss:$8 sps:$4 sm:$0xff]   ;;  %v2269_v28 = vld [vmem:[%s3266_s0 + $0x64] ss:$8 sps:$4 sm:$0xff]   ;;  %v2271_v29 = vld [vmem:[%s3266_s0 + $0x60] ss:$8 sps:$4 sm:$0xff]  }
   0xb   :  { %1953 = vmatpush3.bf16.msra.mxu0 %v2240_v5  ;;  %v2272_v30 = vld [vmem:[%s3266_s0 + $0x74] ss:$8 sps:$4 sm:$0xff]   ;;  %v2274_v31 = vld [vmem:[%s3266_s0 + $0x70] ss:$8 sps:$4 sm:$0xff]   ;;  %v2520_v33 = vld [vmem:[%s3267_s2] ss:$0 sm:$0xff] }
   0xc   :  { %1954 = vmatprep.subr.bf16.mxu0 %v2241_v6  ;;  %s2355_s0 = smov 64   ;;  %s2356_s2 = smov 32  }
   0xf   :  { %1955 = vmatpush3.bf16.msra.mxu0 %v2242_v7 }
  0x10   :  { %1956 = vmatprep.subr.bf16.mxu0 %v2243_v8 }
  0x13   :  { %1957 = vmatpush3.bf16.msra.mxu0 %v2244_v9 }
  0x14   :  { %1958 = vmatprep.subr.bf16.mxu0 %v2245_v10 }
  0x17   :  { %1959 = vmatpush3.bf16.msra.mxu0 %v2246_v12 }
  0x18   :  { %1960 = vmatprep.subr.bf16.mxu0 %v2247_v13 }
  0x1b   :  { %1961 = vmatpush3.bf16.msra.mxu0 %v2248_v14 }
  0x1c   :  { %1962 = vmatprep.subr.bf16.mxu0 %v2249_v15 }
  0x1f   :  { %1963 = vmatpush3.bf16.msra.mxu0 %v2250_v16 }
  0x22   :  { %305 = vmatmul.mubr.bf16.vlgmr.msra.gmra.mxu0 %v2251_v17 }
  0x23   :  { %312 = vmatprep.mubr.bf16.mxu0 %v2254_v18 }
  0x2a   :  { %313 = vmatmul.mubr.bf16.gmra.mxu0 %v2256_v19 }
  0x2b   :  { %320 = vmatprep.mubr.bf16.mxu0 %v2257_v20 }
  0x32   :  { %321 = vmatmul.mubr.bf16.gmra.mxu0 %v2259_v21 }
  0x33   :  { %328 = vmatprep.mubr.bf16.mxu0 %v2260_v22 }
  0x3a   :  { %329 = vmatmul.mubr.bf16.gmra.mxu0 %v2262_v23 }
  0x3b   :  { %336 = vmatprep.mubr.bf16.mxu0 %v2263_v24 }
  0x42   :  { %337 = vmatmul.mubr.bf16.gmra.mxu0 %v2265_v25 }
  0x43   :  { %344 = vmatprep.mubr.bf16.mxu0 %v2266_v26 }
  0x4a   :  { %345 = vmatmul.mubr.bf16.gmra.mxu0 %v2268_v27 }
  0x4b   :  { %352 = vmatprep.mubr.bf16.mxu0 %v2269_v28 }
  0x52   :  { %353 = vmatmul.mubr.bf16.gmra.mxu0 %v2271_v29 }
  0x53   :  { %360 = vmatprep.mubr.bf16.mxu0 %v2272_v30 }
  0x5a   :  { %361 = vmatmul.mubr.bf16.gmra.mxu0 %v2274_v31 }
  0xe2   :  { %v1964_v32 = vpop.f32.mrf.mxu0 }
  0xe4   :  { %v1965_v34 = vpop.f32.mrf.mxu0 }
  0xe5   :  { %v1966_v35 = vadd.f32 %v1965_v34, %v1964_v32 }
  0xe6   :  { %v1967_v36 = vpop.f32.mrf.mxu0 }
  0xe7   :  { %v307_v37 = vadd.f32 %v1966_v35, %v2520_v33 }
  0xe8   :  { %v1968_v38 = vpop.f32.mrf.mxu0 }
  0xe9   :  { %v1969_v39 = vadd.f32 %v1968_v38, %v1967_v36  ;;  %v2523_v40 = vmax.f32 %v307_v37, 0.0 }
  0xea   :  { %v1970_v41 = vpop.f32.mrf.mxu0 }
  0xeb   :  { %v310_v42 = vadd.f32 %v1969_v39, %v2520_v33  ;;  %v472_v47 = vrot.slane %v2523_v40, 2  ;;  %v604_v48 = vrot.slane %v2523_v40, 6  ;;  %v438_v49 = vrot.slane %v2523_v40, 1 }
  0xec   :  { %v1971_v43 = vpop.f32.mrf.mxu0  ;;  %v570_v50 = vrot.slane %v2523_v40, 5  ;;  %v506_v54 = vrot.slane %v2523_v40, 3  ;;  %v638_v58 = vrot.slane %v2523_v40, 7  ;;  %v540_v63 = vrot.slane %v2523_v40, 4 }
  0xed   :  { %v2526_v44 = vmax.f32 %v310_v42, 0.0  ;;  %v1972_v45 = vadd.f32 %v1971_v43, %v1970_v41 }
  0xee   :  { %v1973_v46 = vpop.f32.mrf.mxu0 }
  0xef   :  { %v315_v51 = vadd.f32 %v1972_v45, %v2520_v33  ;;  %v473_v52 = vrot.slane %v2526_v44, 1  ;;  %v605_v53 = vrot.slane %v2526_v44, 5  ;;  %v571_v56 = vrot.slane %v2526_v44, 4 }
  0xf0   :  { %v1974_v55 = vpop.f32.mrf.mxu0  ;;  %v507_v57 = vrot.slane %v2526_v44, 2  ;;  %v639_v59 = vrot.slane %v2526_v44, 6  ;;  %v439_v62 = vsel %vm402_vm0, %v2526_v44, %v438_v49  ;;  %v401_v3 = vrot.slane %v2526_v44, 7 }
  0xf1   :  { %v2540_v60 = vmax.f32 %v315_v51, 0.0  ;;  %v1975_v61 = vadd.f32 %v1974_v55, %v1973_v46  ;;  %v474_v1 = vsel %vm402_vm0, %v473_v52, %v472_v47  ;;  %v606_v2 = vsel %vm402_vm0, %v605_v53, %v604_v48 }
  0xf2   :  { %v1976_v0 = vpop.f32.mrf.mxu0  ;;  %v541_v4 = vrot.slane %v2526_v44, 3  ;;  %v572_v7 = vsel %vm402_vm0, %v571_v56, %v570_v50  ;;  %v508_v8 = vsel %vm402_vm0, %v507_v57, %v506_v54  ;;  %v640_v13 = vsel %vm402_vm0, %v639_v59, %v638_v58 }
  0xf3   :  { %v318_v5 = vadd.f32 %v1975_v61, %v2520_v33  ;;  %v607_v6 = vrot.slane %v2540_v60, 4  ;;  %v440_v10 = vrot.slane %v2540_v60, 7  ;;  %v573_v11 = vrot.slane %v2540_v60, 3 }
  0xf4   :  { %v1977_v9 = vpop.f32.mrf.mxu0  ;;  %v509_v12 = vrot.slane %v2540_v60, 1  ;;  %v475_v16 = vsel %vm405_vm1, %v2540_v60, %v474_v1  ;;  %v641_v17 = vrot.slane %v2540_v60, 5  ;;  %v404_v21 = vrot.slane %v2540_v60, 6 }
  0xf5   :  { %v2557_v14 = vmax.f32 %v318_v5, 0.0  ;;  %v1978_v15 = vadd.f32 %v1977_v9, %v1976_v0  ;;  %v608_v19 = vsel %vm405_vm1, %v607_v6, %v606_v2  ;;  %v542_v22 = vsel %vm402_vm0, %v541_v4, %v540_v63 }
  0xf6   :  { %v1979_v18 = vpop.f32.mrf.mxu0  ;;  %v510_v20 = vsel %vm405_vm1, %v509_v12, %v508_v8  ;;  %v441_v28 = vsel %vm405_vm1, %v440_v10, %v439_v62  ;;  %v574_v29 = vsel %vm405_vm1, %v573_v11, %v572_v7  ;;  %v642_v36 = vsel %vm405_vm1, %v641_v17, %v640_v13 }
  0xf7   :  { %v323_v23 = vadd.f32 %v1978_v15, %v2520_v33  ;;  %v476_v24 = vrot.slane %v2557_v14, 7  ;;  %v609_v25 = vrot.slane %v2557_v14, 3  ;;  %v442_v26 = vrot.slane %v2557_v14, 6 }
  0xf8   :  { %v1980_v27 = vpop.f32.mrf.mxu0  ;;  %v575_v30 = vrot.slane %v2557_v14, 2  ;;  %v643_v31 = vrot.slane %v2557_v14, 4  ;;  %v511_v35 = vsel %vm408_vm2, %v2557_v14, %v510_v20  ;;  %v407_v42 = vrot.slane %v2557_v14, 5 }
  0xf9   :  { %v2574_v32 = vmax.f32 %v323_v23, 0.0  ;;  %v1981_v34 = vadd.f32 %v1980_v27, %v1979_v18  ;;  %v477_v38 = vsel %vm408_vm2, %v476_v24, %v475_v16  ;;  %v610_v39 = vsel %vm408_vm2, %v609_v25, %v608_v19 }
  0xfa   :  { %v1982_v37 = vpop.f32.mrf.mxu0  ;;  %v443_v41 = vsel %vm408_vm2, %v442_v26, %v441_v28  ;;  %v576_v47 = vsel %vm408_vm2, %v575_v30, %v574_v29  ;;  %v644_v52 = vsel %vm408_vm2, %v643_v31, %v642_v36  ;;  %v543_v56 = vrot.slane %v2540_v60, 2 }
  0xfb   :  { %v326_v43 = vadd.f32 %v1981_v34, %v2520_v33  ;;  %v478_v45 = vrot.slane %v2574_v32, 6  ;;  %v611_v46 = vrot.slane %v2574_v32, 2  ;;  %v444_v49 = vrot.slane %v2574_v32, 5 }
  0xfc   :  { %v1983_v48 = vpop.f32.mrf.mxu0  ;;  %v577_v50 = vrot.slane %v2574_v32, 1  ;;  %v512_v51 = vrot.slane %v2574_v32, 7  ;;  %v645_v55 = vrot.slane %v2574_v32, 3  ;;  %v410_v62 = vrot.slane %v2574_v32, 4 }
  0xfd   :  { %v2591_v53 = vmax.f32 %v326_v43, 0.0  ;;  %v1984_v54 = vadd.f32 %v1983_v48, %v1982_v37  ;;  %v479_v58 = vsel %vm411_vm3, %v478_v45, %v477_v38  ;;  %v612_v59 = vsel %vm411_vm3, %v611_v46, %v610_v39 }
  0xfe   :  { %v1985_v57 = vpop.f32.mrf.mxu0  ;;  %v578_v61 = vsel %vm411_vm3, %v577_v50, %v576_v47  ;;  %v445_v5 = vsel %vm411_vm3, %v444_v49, %v443_v41  ;;  %v513_v6 = vsel %vm411_vm3, %v512_v51, %v511_v35  ;;  %v646_v12 = vsel %vm411_vm3, %v645_v55, %v644_v52 }
  0xff   :  { %v331_v63 = vadd.f32 %v1984_v54, %v2520_v33  ;;  %v480_v0 = vrot.slane %v2591_v53, 5  ;;  %v613_v1 = vrot.slane %v2591_v53, 1  ;;  %v446_v2 = vrot.slane %v2591_v53, 4 }
 0x100   :  { %v1986_v4 = vpop.f32.mrf.mxu0  ;;  %v514_v7 = vrot.slane %v2591_v53, 6  ;;  %v647_v8 = vrot.slane %v2591_v53, 2  ;;  %v579_v11 = vsel %vm414_vm4, %v2591_v53, %v578_v61  ;;  %v413_v17 = vrot.slane %v2591_v53, 3 }
 0x101   :  { %v2607_v9 = vmax.f32 %v331_v63, 0.0  ;;  %v1987_v10 = vadd.f32 %v1986_v4, %v1985_v57  ;;  %v481_v15 = vsel %vm414_vm4, %v480_v0, %v479_v58  ;;  %v614_v16 = vsel %vm414_vm4, %v613_v1, %v612_v59 }
 0x102   :  { %v1988_v13 = vpop.f32.mrf.mxu0  ;;  %v544_v18 = vsel %vm405_vm1, %v543_v56, %v542_v22  ;;  %v447_v23 = vsel %vm414_vm4, %v446_v2, %v445_v5  ;;  %v515_v27 = vsel %vm414_vm4, %v514_v7, %v513_v6  ;;  %v648_v28 = vsel %vm414_vm4, %v647_v8, %v646_v12 }
 0x103   :  { %v334_v19 = vadd.f32 %v1987_v10, %v2520_v33  ;;  %v482_v20 = vrot.slane %v2607_v9, 4  ;;  %v448_v24 = vrot.slane %v2607_v9, 3  ;;  %v580_v26 = vrot.slane %v2607_v9, 7 }
 0x104   :  { %v1989_v25 = vpop.f32.mrf.mxu0  ;;  %v649_v29 = vrot.slane %v2607_v9, 1  ;;  %v615_v31 = vsel %vm417_vm5, %v2607_v9, %v614_v16  ;;  %v516_v34 = vrot.slane %v2607_v9, 5  ;;  %v416_v39 = vrot.slane %v2607_v9, 2 }
 0x105   :  { %v2624_v30 = vmax.f32 %v334_v19, 0.0  ;;  %v1990_v22 = vadd.f32 %v1989_v25, %v1988_v13  ;;  %v483_v36 = vsel %vm417_vm5, %v482_v20, %v481_v15  ;;  %v449_v37 = vsel %vm417_vm5, %v448_v24, %v447_v23 }
 0x106   :  { %v1991_v35 = vpop.f32.mrf.mxu0  ;;  %v581_v38 = vsel %vm417_vm5, %v580_v26, %v579_v11  ;;  %v650_v50 = vsel %vm417_vm5, %v649_v29, %v648_v28  ;;  %v545_v51 = vrot.slane %v2557_v14, 1  ;;  %v517_v63 = vsel %vm417_vm5, %v516_v34, %v515_v27 }
 0x107   :  { %v339_v41 = vadd.f32 %v1990_v22, %v2520_v33  ;;  %v484_v43 = vrot.slane %v2624_v30, 3  ;;  %v616_v45 = vrot.slane %v2624_v30, 7  ;;  %v450_v46 = vrot.slane %v2624_v30, 2 }
 0x108   :  { %v1992_v47 = vpop.f32.mrf.mxu0  ;;  %v582_v48 = vrot.slane %v2624_v30, 6  ;;  %v518_v49 = vrot.slane %v2624_v30, 4  ;;  %v2651_v2 = vsel %vm420_vm6, %v2624_v30, %v650_v50  ;;  %v419_v4 = vrot.slane %v2624_v30, 1 }
 0x109   :  { %v2641_v52 = vmax.f32 %v339_v41, 0.0  ;;  %v1993_v54 = vadd.f32 %v1992_v47, %v1991_v35  ;;  %v485_v55 = vsel %vm420_vm6, %v484_v43, %v483_v36  ;;  %v617_v56 = vsel %vm420_vm6, %v616_v45, %v615_v31 }
 0x10a   :  { %v1994_v57 = vpop.f32.mrf.mxu0  ;;  %v2140_v58 = vpack.i.bf16 %v617_v56, %v485_v55  ;;  %v451_v59 = vsel %vm420_vm6, %v450_v46, %v449_v37  ;;  %v583_v61 = vsel %vm420_vm6, %v582_v48, %v581_v38  ;;  %v2659_v10 = vsel %vm420_vm6, %v518_v49, %v517_v63 }
 0x10b   :  { %v342_v0 = vadd.f32 %v1993_v54, %v2520_v33  ;;  %v2135_v1 = vpack.i.bf16 %v583_v61, %v451_v59  ;;  %v486_v6 = vrot.slane %v2641_v52, 2  ;;  %v618_v7 = vrot.slane %v2641_v52, 6 }
 0x10c   :  { %v1995_v5 = vpop.f32.mrf.mxu0  ;;  %2141 = vrot.lane.b32.xlu1 %v2140_v58, %s2355_s0  ;;  %v452_v8 = vrot.slane %v2641_v52, 1  ;;  %v584_v13 = vrot.slane %v2641_v52, 5  ;;  %v546_v15 = vsel %vm408_vm2, %v545_v51, %v544_v18  ;;  %v520_v19 = vrot.slane %v2641_v52, 3 }
 0x10d   :  { %v2661_v11 = vmax.f32 %v342_v0, 0.0  ;;  %v1996_v12 = vadd.f32 %v1995_v5, %v1994_v57  ;;  %2136 = vrot.lane.b32.xlu0 %v2135_v1, %s2356_s2  ;;  %v547_v20 = vsel %vm411_vm3, %v2574_v32, %v546_v15  ;;  %v548_v23 = vrot.slane %v2591_v53, 7 }
 0x10e   :  { %v1997_v16 = vpop.f32.mrf.mxu0  ;;  %v550_v24 = vrot.slane %v2607_v9, 6  ;;  %v652_v28 = vrot.slane %v2641_v52, 7  ;;  %v2150_v22 = vpack.i.bf16 %v2651_v2, %v2659_v10  ;;  %v552_v34 = vrot.slane %v2624_v30, 5  ;;  %v2275_v2 = vld [vmem:[%s3268_s3 + $0x78] sm:$0xff]  }
 0x10f   :  { %v347_v25 = vadd.f32 %v1996_v12, %v2520_v33  ;;  %v487_v26 = vrot.slane %v2661_v11, 1  ;;  %v619_v27 = vrot.slane %v2661_v11, 5  ;;  %v585_v18 = vrot.slane %v2661_v11, 4  ;;  %v2276_v10 = vld [vmem:[%s3268_s3 + $0x38] sm:$0xff]   ;;  %2012 = vmatprep.subr.bf16.mxu1 %v2275_v2 }
 0x110   :  { %v1998_v29 = vpop.f32.mrf.mxu0  ;;  %v549_v31 = vsel %vm414_vm4, %v548_v23, %v547_v20  ;;  %v521_v37 = vrot.slane %v2661_v11, 2  ;;  %v653_v38 = vrot.slane %v2661_v11, 6  ;;  %v453_v46 = vsel %vm402_vm0, %v2661_v11, %v452_v8  ;;  %2013 = vmatpush3.bf16.msra.mxu1 %v2276_v10 }
 0x111   :  { %v2680_v35 = vmax.f32 %v347_v25, 0.0  ;;  %v1999_v36 = vadd.f32 %v1998_v29, %v1997_v16  ;;  %v488_v43 = vsel %vm402_vm0, %v487_v26, %v486_v6  ;;  %v620_v45 = vsel %vm402_vm0, %v619_v27, %v618_v7 }
 0x112   :  { %v2000_v41 = vpop.f32.mrf.mxu0  ;;  %v551_v47 = vsel %vm417_vm5, %v550_v24, %v549_v31  ;;  %v586_v51 = vsel %vm402_vm0, %v585_v18, %v584_v13  ;;  %v522_v63 = vsel %vm402_vm0, %v521_v37, %v520_v19  ;;  %v654_v0 = vsel %vm402_vm0, %v653_v38, %v652_v28 }
 0x113   :  { %v350_v48 = vadd.f32 %v1999_v36, %v2520_v33  ;;  %v621_v49 = vrot.slane %v2680_v35, 4  ;;  %v454_v50 = vrot.slane %v2680_v35, 7  ;;  %v587_v55 = vrot.slane %v2680_v35, 3 }
 0x114   :  { %v2001_v54 = vpop.f32.mrf.mxu0  ;;  %v523_v56 = vrot.slane %v2680_v35, 1  ;;  %v655_v57 = vrot.slane %v2680_v35, 5  ;;  %v2697_v58 = vsel %vm420_vm6, %v552_v34, %v551_v47  ;;  %v489_v5 = vsel %vm405_vm1, %v2680_v35, %v488_v43 }
 0x115   :  { %v2699_v59 = vmax.f32 %v350_v48, 0.0  ;;  %v2002_v61 = vadd.f32 %v2001_v54, %v2000_v41  ;;  %v622_v6 = vsel %vm405_vm1, %v621_v49, %v620_v45  ;;  %v455_v7 = vsel %vm405_vm1, %v454_v50, %v453_v46 }
 0x116   :  { %v2003_v1 = vpop.f32.mrf.mxu0  ;;  %v524_v8 = vsel %vm405_vm1, %v523_v56, %v522_v63  ;;  %v588_v20 = vsel %vm405_vm1, %v587_v55, %v586_v51  ;;  %v656_v24 = vsel %vm405_vm1, %v655_v57, %v654_v0  ;;  %v403_v25 = vsel %vm402_vm0, %v401_v3, %v2523_v40 }
 0x117   :  { %v355_v12 = vadd.f32 %v2002_v61, %v2520_v33  ;;  %v490_v13 = vrot.slane %v2699_v59, 7  ;;  %v623_v15 = vrot.slane %v2699_v59, 3  ;;  %v456_v16 = vrot.slane %v2699_v59, 6 }
 0x118   :  { %v2004_v19 = vpop.f32.mrf.mxu0  ;;  %v589_v23 = vrot.slane %v2699_v59, 2  ;;  %v525_v28 = vsel %vm408_vm2, %v2699_v59, %v524_v8  ;;  %v657_v29 = vrot.slane %v2699_v59, 4  ;;  %v406_v44 = vsel %vm405_vm1, %v404_v21, %v403_v25 }
 0x119   :  { %v2719_v26 = vmax.f32 %v355_v12, 0.0  ;;  %v2005_v27 = vadd.f32 %v2004_v19, %v2003_v1  ;;  %v491_v31 = vsel %vm408_vm2, %v490_v13, %v489_v5  ;;  %v624_v34 = vsel %vm408_vm2, %v623_v15, %v622_v6 }
 0x11a   :  { %v2006_v18 = vpop.f32.mrf.mxu0  ;;  %v457_v36 = vsel %vm408_vm2, %v456_v16, %v455_v7  ;;  %v590_v43 = vsel %vm408_vm2, %v589_v23, %v588_v20  ;;  %v409_v60 = vsel %vm408_vm2, %v407_v42, %v406_v44  ;;  %v658_v48 = vsel %vm408_vm2, %v657_v29, %v656_v24 }
 0x11b   :  { %v358_v40 = vadd.f32 %v2005_v27, %v2520_v33  ;;  %v492_v3 = vrot.slane %v2719_v26, 6  ;;  %v625_v37 = vrot.slane %v2719_v26, 2  ;;  %v458_v38 = vrot.slane %v2719_v26, 5 }
 0x11c   :  { %v2007_v41 = vpop.f32.mrf.mxu0  ;;  %v591_v45 = vrot.slane %v2719_v26, 1  ;;  %v526_v46 = vrot.slane %v2719_v26, 7  ;;  %v659_v49 = vrot.slane %v2719_v26, 3  ;;  %v412_v6 = vsel %vm411_vm3, %v410_v62, %v409_v60 }
 0x11d   :  { %v2740_v21 = vmax.f32 %v358_v40, 0.0  ;;  %v2008_v47 = vadd.f32 %v2007_v41, %v2006_v18  ;;  %v493_v51 = vsel %vm411_vm3, %v492_v3, %v491_v31  ;;  %v626_v54 = vsel %vm411_vm3, %v625_v37, %v624_v34 }
 0x11e   :  { %v2009_v50 = vpop.f32.mrf.mxu0  ;;  %v459_v55 = vsel %vm411_vm3, %v458_v38, %v457_v36  ;;  %v592_v56 = vsel %vm411_vm3, %v591_v45, %v590_v43  ;;  %v527_v0 = vsel %vm411_vm3, %v526_v46, %v525_v28  ;;  %v660_v13 = vsel %vm411_vm3, %v659_v49, %v658_v48 }
 0x11f   :  { %v363_v14 = vadd.f32 %v2008_v47, %v2520_v33  ;;  %v494_v42 = vrot.slane %v2740_v21, 5  ;;  %v627_v57 = vrot.slane %v2740_v21, 1  ;;  %v460_v61 = vrot.slane %v2740_v21, 4 }
 0x120   :  { %v2010_v63 = vpop.f32.mrf.mxu0  ;;  %v528_v1 = vrot.slane %v2740_v21, 6  ;;  %v661_v5 = vrot.slane %v2740_v21, 2  ;;  %v593_v12 = vsel %vm414_vm4, %v2740_v21, %v592_v56  ;;  %v415_v32 = vsel %vm414_vm4, %v413_v17, %v412_v6 }
 0x121   :  { %v2758_v7 = vmax.f32 %v363_v14, 0.0  ;;  %v2011_v8 = vadd.f32 %v2010_v63, %v2009_v50  ;;  %v495_v15 = vsel %vm414_vm4, %v494_v42, %v493_v51  ;;  %v628_v16 = vsel %vm414_vm4, %v627_v57, %v626_v54 }
 0x122   :  { %v461_v19 = vsel %vm414_vm4, %v460_v61, %v459_v55  ;;  %v529_v24 = vsel %vm414_vm4, %v528_v1, %v527_v0  ;;  %v662_v27 = vsel %vm414_vm4, %v661_v5, %v660_v13  ;;  %v418_v53 = vsel %vm417_vm5, %v416_v39, %v415_v32 }
 0x123   :  { %v366_v62 = vadd.f32 %v2011_v8, %v2520_v33  ;;  %v496_v20 = vrot.slane %v2758_v7, 4  ;;  %v462_v23 = vrot.slane %v2758_v7, 3  ;;  %v594_v25 = vrot.slane %v2758_v7, 7 }
 0x124   :  { %v663_v28 = vrot.slane %v2758_v7, 1  ;;  %v629_v33 = vsel %vm417_vm5, %v2758_v7, %v628_v16  ;;  %v530_v17 = vrot.slane %v2758_v7, 5  ;;  %v2785_v18 = vsel %vm420_vm6, %v419_v4, %v418_v53 }
 0x125   :  { %v384_v29 = vmax.f32 %v366_v62, 0.0  ;;  %v497_v31 = vsel %vm417_vm5, %v496_v20, %v495_v15  ;;  %v463_v34 = vsel %vm417_vm5, %v462_v23, %v461_v19  ;;  %v595_v36 = vsel %vm417_vm5, %v594_v25, %v593_v12  ;;  %v2279_v62 = vld [vmem:[%s3268_s3 + $0x68] sm:$0xff]   ;;  %v2281_v23 = vld [vmem:[%s3268_s3 + $0x60] sm:$0xff]  }
 0x126   :  { %v422_v9 = vrot.slane %v2661_v11, 7  ;;  %v664_v38 = vsel %vm417_vm5, %v663_v28, %v662_v27  ;;  %v424_v4 = vrot.slane %v2680_v35, 6  ;;  %v531_v48 = vsel %vm417_vm5, %v530_v17, %v529_v24  ;;  %v2280_v20 = vld [vmem:[%s3268_s3 + $0x28] sm:$0xff]   ;;  %v2282_v24 = vld [vmem:[%s3268_s3 + $0x20] sm:$0xff]  }
 0x127   :  { %v498_v39 = vrot.slane %v384_v29, 3  ;;  %v630_v44 = vrot.slane %v384_v29, 7  ;;  %v464_v40 = vrot.slane %v384_v29, 2  ;;  %v596_v3 = vrot.slane %v384_v29, 6 }
 0x128   :  { %v532_v37 = vrot.slane %v384_v29, 4  ;;  %v423_v30 = vsel %vm402_vm0, %v422_v9, %v2641_v52  ;;  %v426_v51 = vrot.slane %v2699_v59, 5  ;;  %v428_v54 = vrot.slane %v2719_v26, 4 }
 0x129   :  { %v499_v41 = vsel %vm420_vm6, %v498_v39, %v497_v31  ;;  %v631_v43 = vsel %vm420_vm6, %v630_v44, %v629_v33  ;;  %v465_v45 = vsel %vm420_vm6, %v464_v40, %v463_v34  ;;  %v597_v46 = vsel %vm420_vm6, %v596_v3, %v595_v36 }
 0x12a   :  { %v2155_v60 = vpack.i.bf16 %v631_v43, %v499_v41  ;;  %v2145_v47 = vpack.i.bf16 %v597_v46, %v465_v45  ;;  %v425_v49 = vsel %vm405_vm1, %v424_v4, %v423_v30  ;;  %v533_v50 = vsel %vm420_vm6, %v532_v37, %v531_v48  ;;  %v2284_v30 = vld [vmem:[%s3268_s3 + $0x18] sm:$0xff]  }
 0x12b   :  { %v430_v55 = vrot.slane %v2740_v21, 3  ;;  %v665_v56 = vsel %vm420_vm6, %v384_v29, %v664_v38  ;;  %v432_v14 = vrot.slane %v2758_v7, 2  ;;  %v554_v42 = vrot.slane %v2641_v52, 4  ;;  %v2283_v38 = vld [vmem:[%s3268_s3 + $0x58] sm:$0xff]  }
 0x12c   :  { %2156 = vrot.lane.b32.xlu1 %v2155_v60, %s2355_s0  ;;  %2146 = vrot.lane.b32.xlu0 %v2145_v47, %s2356_s2  ;;  %v555_v57 = vrot.slane %v2661_v11, 3  ;;  %v427_v61 = vsel %vm408_vm2, %v426_v51, %v425_v49  ;;  %v434_v63 = vrot.slane %v384_v29, 1  ;;  %v557_v0 = vrot.slane %v2680_v35, 2 }
 0x12d   :  { %v559_v1 = vrot.slane %v2699_v59, 1  ;;  %v2160_v5 = vpack.i.bf16 %v665_v56, %v533_v50  ;;  %v429_v6 = vsel %vm411_vm3, %v428_v54, %v427_v61  ;;  %v562_v12 = vrot.slane %v2740_v21, 7  ;;  %v2286_v56 = vld [vmem:[%s3268_s3 + $0x10] sm:$0xff]  }
 0x12e   :  { %v556_v8 = vsel %vm402_vm0, %v555_v57, %v554_v42  ;;  %v431_v13 = vsel %vm414_vm4, %v430_v55, %v429_v6  ;;  %v564_v11 = vrot.slane %v2758_v7, 6  ;;  %v566_v15 = vrot.slane %v384_v29, 5  ;;  %v2285_v55 = vld [vmem:[%s3268_s3 + $0x50] sm:$0xff]  }
 0x12f   :  { %v558_v52 = vsel %vm405_vm1, %v557_v0, %v556_v8  ;;  %v433_v35 = vsel %vm417_vm5, %v432_v14, %v431_v13 }
 0x130   :  { %2161 = vrot.lane.b32.xlu1 %v2160_v5, %s2357_s24  ;;  %2151 = vrot.lane.b32.xlu0 %v2150_v22, %s2357_s24  ;;  %v560_v59 = vsel %vm408_vm2, %v559_v1, %v558_v52  ;;  %v435_v16 = vsel %vm420_vm6, %v434_v63, %v433_v35  ;;  %v2277_v22 = vld [vmem:[%s3268_s3 + $0x70] sm:$0xff]  }
 0x131   :  { %v561_v21 = vsel %vm411_vm3, %v2719_v26, %v560_v59  ;;  %v2278_v26 = vld [vmem:[%s3268_s3 + $0x30] sm:$0xff]   ;;  %2014 = vmatprep.subr.bf16.mxu1 %v2277_v22  ;;  %v2287_v59 = vld [vmem:[%s3268_s3 + $0x48] sm:$0xff]  }
 0x132   :  { %v563_v19 = vsel %vm414_vm4, %v562_v12, %v561_v21  ;;  %2015 = vmatpush3.bf16.msra.mxu1 %v2278_v26 }
 0x133   :  { %v565_v7 = vsel %vm417_vm5, %v564_v11, %v563_v19  ;;  %2016 = vmatprep.subr.bf16.mxu1 %v2279_v62 }
 0x134   :  { %v567_v32 = vsel %vm420_vm6, %v566_v15, %v565_v7  ;;  %v2288_v15 = vld [vmem:[%s3268_s3 + $0x8] sm:$0xff]  }
 0x136   :  { %2017 = vmatpush3.bf16.msra.mxu1 %v2280_v20 }
 0x137   :  { %2018 = vmatprep.subr.bf16.mxu1 %v2281_v23  ;;  %v2289_v23 = vld [vmem:[%s3268_s3 + $0x40] sm:$0xff]  }
 0x13a   :  { %2019 = vmatpush3.bf16.msra.mxu1 %v2282_v24  ;;  %v2290_v24 = vld [vmem:[%s3268_s3] sm:$0xff]  }
 0x13b   :  { %2020 = vmatprep.subr.bf16.mxu1 %v2283_v38  ;;  %v2291_v38 = vld [vmem:[%s3268_s3 + $0xf8] sm:$0xff]  }
 0x13e   :  { %2021 = vmatpush3.bf16.msra.mxu1 %v2284_v30 }
 0x13f   :  { %2022 = vmatprep.subr.bf16.mxu1 %v2285_v55 }
 0x142   :  { %2023 = vmatpush3.bf16.msra.mxu1 %v2286_v56 }
 0x143   :  { %2024 = vmatprep.subr.bf16.mxu1 %v2287_v59 }
 0x146   :  { %2025 = vmatpush3.bf16.msra.mxu1 %v2288_v15 }
 0x147   :  { %2026 = vmatprep.subr.bf16.mxu1 %v2289_v23 }
 0x14a   :  { %2027 = vmatpush3.bf16.msra.mxu1 %v2290_v24 }
 0x14b   :  { %2040 = vmatprep.subr.bf16.mxu1 %v2291_v38 }
 0x17e   :  { %v2142_v25 = vpop.permute.xlu1 %2141 }
 0x17f   :  { %v2137_v27 = vpop.permute.xlu0 %2136  ;;  %v2144_v34 = vunpack.i.h.bf16 %v2142_v25  ;;  %v2143_v36 = vunpack.i.l.bf16 %v2142_v25 }
 0x180   :  { %v2139_v28 = vunpack.i.h.bf16 %v2137_v27  ;;  %v2138_v53 = vunpack.i.l.bf16 %v2137_v27 }
 0x182   :  { %v681_v44 = vsel %vm672_vm7, %v2697_v58, %v2139_v28  ;;  %v673_v40 = vsel %vm672_vm7, %v2785_v18, %v2138_v53 }
 0x183   :  { %v676_v47 = vsel %vm675_vm8, %v673_v40, %v2143_v36  ;;  %v683_v48 = vsel %vm675_vm8, %v681_v44, %v2144_v34 }
 0x19e   :  { %v2157_v29 = vpop.permute.xlu1 %2156  ;;  %v2147_v33 = vpop.permute.xlu0 %2146 }
 0x19f   :  { %v2149_v17 = vunpack.i.h.bf16 %v2147_v33  ;;  %v2148_v31 = vunpack.i.l.bf16 %v2147_v33  ;;  %v2159_v9 = vunpack.i.h.bf16 %v2157_v29  ;;  %v2158_v39 = vunpack.i.l.bf16 %v2157_v29 }
 0x1a1   :  { %v682_v3 = vsel %vm672_vm7, %v567_v32, %v2149_v17  ;;  %v674_v37 = vsel %vm672_vm7, %v435_v16, %v2148_v31 }
 0x1a2   :  { %v2162_v4 = vpop.permute.xlu1 %2161  ;;  %v2152_v41 = vpop.permute.xlu0 %2151  ;;  %v677_v58 = vsel %vm675_vm8, %v674_v37, %v2158_v39  ;;  %v684_v18 = vsel %vm675_vm8, %v682_v3, %v2159_v9 }
 0x1a3   :  { %v2164_v43 = vunpack.i.h.bf16 %v2162_v4  ;;  %v2163_v45 = vunpack.i.l.bf16 %v2162_v4  ;;  %v2154_v46 = vunpack.i.h.bf16 %v2152_v41  ;;  %v2153_v60 = vunpack.i.l.bf16 %v2152_v41 }
 0x1a5   :  { %v680_v49 = vsel %vm678_vm9, %v677_v58, %v2163_v45  ;;  %v686_v50 = vsel %vm678_vm9, %v684_v18, %v2164_v43  ;;  %v679_v51 = vsel %vm678_vm9, %v676_v47, %v2153_v60  ;;  %v685_v54 = vsel %vm678_vm9, %v683_v48, %v2154_v46 }
 0x1a6   :  { %v692_v14 = vrot.slane %v679_v51, 1  ;;  %v712_v42 = vrot.slane %v685_v54, 1  ;;  %v689_v57 = vrot.slane %v680_v49, 7  ;;  %v705_v61 = vrot.slane %v686_v50, 7 }
 0x1a7   :  { %v699_v63 = vrot.slane %v679_v51, 3  ;;  %v700_v0 = vrot.slane %v680_v49, 2  ;;  %v727_v1 = vrot.slane %v685_v54, 3  ;;  %v728_v35 = vrot.slane %v686_v50, 2 }
 0x1a8   :  { %v2878_v5 = vsel %vm408_vm2, %v680_v49, %v692_v14  ;;  %v2881_v6 = vsel %vm408_vm2, %v686_v50, %v712_v42  ;;  %v2884_v8 = vsel %vm402_vm0, %v680_v49, %v692_v14  ;;  %v2887_v12 = vsel %vm402_vm0, %v686_v50, %v712_v42 }
 0x1a9   :  { %v2170_v13 = vpack.i.bf16 %v2881_v6, %v2878_v5  ;;  %v2165_v52 = vpack.i.bf16 %v2887_v12, %v2884_v8  ;;  %v2894_v11 = vsel %vm408_vm2, %v689_v57, %v679_v51  ;;  %v2903_v16 = vsel %vm408_vm2, %v705_v61, %v685_v54 }
 0x1aa   :  { %v2906_v21 = vsel %vm402_vm0, %v689_v57, %v679_v51  ;;  %v2909_v19 = vsel %vm402_vm0, %v705_v61, %v685_v54  ;;  %v2914_v7 = vsel %vm414_vm4, %v689_v57, %v679_v51  ;;  %v2917_v32 = vsel %vm414_vm4, %v705_v61, %v685_v54 }
 0x1ab   :  { %2171 = vrot.lane.b32.xlu1 %v2170_v13, %s2355_s0  ;;  %2166 = vrot.lane.b32.xlu0 %v2165_v52, %s2355_s0  ;;  %v2920_v2 = vsel %vm414_vm4, %v680_v49, %v692_v14  ;;  %v2923_v10 = vsel %vm414_vm4, %v686_v50, %v712_v42  ;;  %v2926_v22 = vsel %vm408_vm2, %v700_v0, %v699_v63  ;;  %v695_v28 = vrot.slane %v679_v51, 2 }
 0x1ac   :  { %v2185_v26 = vpack.i.bf16 %v2903_v16, %v2894_v11  ;;  %v2175_v62 = vpack.i.bf16 %v2909_v19, %v2906_v21  ;;  %v2933_v20 = vsel %vm408_vm2, %v728_v35, %v727_v1  ;;  %v2942_v25 = vsel %vm402_vm0, %v700_v0, %v699_v63 }
 0x1ad   :  { %v2945_v27 = vsel %vm402_vm0, %v728_v35, %v727_v1  ;;  %v696_v53 = vrot.slane %v680_v49, 1  ;;  %v719_v29 = vrot.slane %v685_v54, 2  ;;  %v2190_v33 = vpack.i.bf16 %v2917_v32, %v2914_v7 }
 0x1ae   :  { %v720_v17 = vrot.slane %v686_v50, 1  ;;  %v2952_v31 = vsel %vm414_vm4, %v700_v0, %v699_v63  ;;  %v2955_v34 = vsel %vm414_vm4, %v728_v35, %v727_v1  ;;  %v2180_v36 = vpack.i.bf16 %v2923_v10, %v2920_v2 }
 0x1af   :  { %2186 = vrot.lane.b32.xlu1 %v2185_v26, %s2355_s0  ;;  %2176 = vrot.lane.b32.xlu0 %v2175_v62, %s2355_s0  ;;  %v2960_v9 = vsel %vm408_vm2, %v696_v53, %v695_v28  ;;  %v2963_v39 = vsel %vm402_vm0, %v696_v53, %v695_v28  ;;  %v2966_v44 = vsel %vm414_vm4, %v696_v53, %v695_v28  ;;  %v808_v50 = vrot.slane %v2887_v12, 4 }
 0x1b0   :  { %v2969_v40 = vsel %vm408_vm2, %v720_v17, %v719_v29  ;;  %v2972_v3 = vsel %vm402_vm0, %v720_v17, %v719_v29  ;;  %v2975_v37 = vsel %vm414_vm4, %v720_v17, %v719_v29  ;;  %v2200_v30 = vpack.i.bf16 %v2933_v20, %v2926_v22 }
 0x1b1   :  { %v2195_v4 = vpack.i.bf16 %v2945_v27, %v2942_v25  ;;  %v2210_v41 = vpack.i.bf16 %v2969_v40, %v2960_v9  ;;  %v2205_v43 = vpack.i.bf16 %v2972_v3, %v2963_v39  ;;  %v2220_v45 = vpack.i.bf16 %v2975_v37, %v2966_v44 }
 0x1b2   :  { %v2215_v46 = vpack.i.bf16 %v2955_v34, %v2952_v31  ;;  %v816_v1 = vrot.slane %v2878_v5, 4  ;;  %v807_v13 = vrot.slane %v2909_v19, 4  ;;  %v815_v19 = vrot.slane %v2894_v11, 4 }
 0x1b3   :  { %2191 = vrot.lane.b32.xlu1 %v2190_v33, %s2355_s0  ;;  %2181 = vrot.lane.b32.xlu0 %v2180_v36, %s2355_s0  ;;  %v840_v36 = vrot.slane %v2923_v10, 4 }
 0x1b7   :  { %2201 = vrot.lane.b32.xlu1 %v2200_v30, %s2355_s0  ;;  %2196 = vrot.lane.b32.xlu0 %v2195_v4, %s2355_s0 }
 0x1bb   :  { %2211 = vrot.lane.b32.xlu1 %v2210_v41, %s2355_s0  ;;  %2206 = vrot.lane.b32.xlu0 %v2205_v43, %s2355_s0 }
 0x1bf   :  { %2221 = vrot.lane.b32.xlu1 %v2220_v45, %s2355_s0  ;;  %2216 = vrot.lane.b32.xlu0 %v2215_v46, %s2355_s0 }
 0x21d   :  { %v2172_v60 = vpop.permute.xlu1 %2171  ;;  %v2167_v58 = vpop.permute.xlu0 %2166 }
 0x21e   :  { %v2174_v18 = vunpack.i.h.bf16 %v2172_v60  ;;  %v2173_v47 = vunpack.i.l.bf16 %v2172_v60  ;;  %v2169_v48 = vunpack.i.h.bf16 %v2167_v58  ;;  %v2168_v49 = vunpack.i.l.bf16 %v2167_v58 }
 0x220   :  { %v750_v51 = vsel %vm675_vm8, %v2173_v47, %v2174_v18  ;;  %v718_v54 = vsel %vm675_vm8, %v2168_v49, %v2169_v48 }
 0x221   :  { %v824_v55 = vrot.slane %v750_v51, 2  ;;  %v800_v56 = vrot.slane %v718_v54, 6  ;;  %v2187_v14 = vpop.permute.xlu1 %2186  ;;  %v2177_v42 = vpop.permute.xlu0 %2176  ;;  %v2292_v51 = vld [vmem:[%s3268_s3 + $0xb8] sm:$0xff]  }
 0x222   :  { %v2189_v57 = vunpack.i.h.bf16 %v2187_v14  ;;  %v2188_v61 = vunpack.i.l.bf16 %v2187_v14  ;;  %v2179_v63 = vunpack.i.h.bf16 %v2177_v42  ;;  %v2178_v0 = vunpack.i.l.bf16 %v2177_v42 }
 0x223   :  { %v849_v12 = vsel %vm847_vm10, %v2884_v8, %v800_v56  ;;  %v863_v5 = vsel %vm847_vm10, %v824_v55, %v2881_v6  ;;  %v2293_v55 = vld [vmem:[%s3268_s3 + $0xf0] sm:$0xff]   ;;  %v810_v56 = vrot.slane %v2945_v27, 4 }
 0x224   :  { %v744_v52 = vsel %vm675_vm8, %v2188_v61, %v2189_v57  ;;  %v711_v35 = vsel %vm675_vm8, %v2178_v0, %v2179_v63  ;;  %v854_v59 = vsel %vm852_vm11, %v849_v12, %v808_v50  ;;  %v867_v6 = vsel %vm852_vm11, %v863_v5, %v2920_v2  ;;  %v2294_v12 = vld [vmem:[%s3268_s3 + $0xb0] sm:$0xff]  }
 0x225   :  { %v823_v15 = vrot.slane %v744_v52, 2  ;;  %v799_v26 = vrot.slane %v711_v35, 6  ;;  %v2192_v62 = vpop.permute.xlu1 %2191  ;;  %v2182_v23 = vpop.permute.xlu0 %2181  ;;  %v859_v24 = vsel %vm857_vm12, %v854_v59, %v816_v1  ;;  %v879_v57 = vpack.c.bf16 %v840_v36, %v840_v36 }
 0x226   :  { %v2194_v28 = vunpack.i.h.bf16 %v2192_v62  ;;  %v2193_v53 = vunpack.i.l.bf16 %v2192_v62  ;;  %v2184_v8 = vunpack.i.h.bf16 %v2182_v23  ;;  %v2183_v29 = vunpack.i.l.bf16 %v2182_v23 }
 0x227   :  { %v848_v33 = vsel %vm847_vm10, %v2906_v21, %v799_v26  ;;  %v862_v17 = vsel %vm847_vm10, %v823_v15, %v2903_v16  ;;  %v818_v61 = vrot.slane %v2926_v22, 4  ;;  %v2295_v22 = vld [vmem:[%s3268_s3 + $0xe8] sm:$0xff]   ;;  %v839_v35 = vrot.slane %v2917_v32, 4 }
 0x228   :  { %v780_v38 = vsel %vm675_vm8, %v2193_v53, %v2194_v28  ;;  %v786_v30 = vsel %vm675_vm8, %v2183_v29, %v2184_v8  ;;  %v853_v4 = vsel %vm852_vm11, %v848_v33, %v807_v13  ;;  %v866_v16 = vsel %vm852_vm11, %v862_v17, %v2914_v7  ;;  %v2296_v32 = vld [vmem:[%s3268_s3 + $0xa8] sm:$0xff]   ;;  %v2298_v33 = vld [vmem:[%s3268_s3 + $0xa0] sm:$0xff]   ;;  %v2299_v17 = vld [vmem:[%s3268_s3 + $0xd8] sm:$0xff]  }
 0x229   :  { %v831_v41 = vrot.slane %v780_v38, 6  ;;  %v2202_v43 = vpop.permute.xlu1 %2201  ;;  %v2197_v11 = vpop.permute.xlu0 %2196  ;;  %v832_v45 = vrot.slane %v786_v30, 6  ;;  %v858_v21 = vsel %vm857_vm12, %v853_v4, %v815_v19  ;;  %v809_v59 = vrot.slane %v2972_v3, 4 }
 0x22a   :  { %v2204_v46 = vunpack.i.h.bf16 %v2202_v43  ;;  %v2203_v10 = vunpack.i.l.bf16 %v2202_v43  ;;  %v2199_v60 = vunpack.i.h.bf16 %v2197_v11  ;;  %v2198_v58 = vunpack.i.l.bf16 %v2197_v11  ;;  %v2302_v11 = vld [vmem:[%s3268_s3 + $0x90] sm:$0xff]  }
 0x22b   :  { %v871_v18 = vsel %vm857_vm12, %v867_v6, %v832_v45  ;;  %v870_v47 = vsel %vm857_vm12, %v866_v16, %v831_v41  ;;  %v817_v62 = vrot.slane %v2960_v9, 4  ;;  %v878_v53 = vpack.c.bf16 %v839_v35, %v839_v35  ;;  %v2297_v9 = vld [vmem:[%s3268_s3 + $0xe0] sm:$0xff]   ;;  %v2301_v6 = vld [vmem:[%s3268_s3 + $0xd0] sm:$0xff]   ;;  %v2303_v45 = vld [vmem:[%s3268_s3 + $0xc8] sm:$0xff]  }
 0x22c   :  { %v762_v2 = vsel %vm675_vm8, %v2203_v10, %v2204_v46  ;;  %v734_v48 = vsel %vm675_vm8, %v2198_v58, %v2199_v60  ;;  %v875_v49 = vpack.c.bf16 %v871_v18, %v859_v24  ;;  %v874_v50 = vpack.c.bf16 %v870_v47, %v858_v21  ;;  %v2304_v46 = vld [vmem:[%s3268_s3 + $0x88] sm:$0xff]   ;;  %v2305_v10 = vld [vmem:[%s3268_s3 + $0xc0] sm:$0xff]  }
 0x22d   :  { %v802_v54 = vrot.slane %v734_v48, 6  ;;  %v2207_v7 = vpop.permute.xlu0 %2206  ;;  %v826_v63 = vrot.slane %v762_v2, 2  ;;  %v2212_v8 = vpop.permute.xlu1 %2211  ;;  %v2306_v18 = vld [vmem:[%s3268_s3 + $0x80] sm:$0xff]   ;;  %v842_v48 = vrot.slane %v2955_v34, 4  ;;  %v2309_v34 = vld [vmem:[%s3269_s5 + $0x70] sm:$0xff]  }
 0x22e   :  { %v2209_v14 = vunpack.i.h.bf16 %v2207_v7  ;;  %v2208_v42 = vunpack.i.l.bf16 %v2207_v7  ;;  %1177 = vmatprep.mubr.bf16.mxu1 %v875_v49  ;;  %v2214_v36 = vunpack.i.h.bf16 %v2212_v8  ;;  %v2213_v38 = vunpack.i.l.bf16 %v2212_v8  ;;  %v2311_v7 = vld [vmem:[%s3269_s5 + $0x68] sm:$0xff]   ;;  %v2327_v35 = vld [vmem:[%s3269_s5 + $0xe0] sm:$0xff]  }
 0x22f   :  { %1178 = vmatmul.mubr.bf16.vlgmr.msra.gmra.mxu1 %v874_v50  ;;  %v851_v0 = vsel %vm847_vm10, %v2942_v25, %v802_v54  ;;  %v865_v24 = vsel %vm847_vm10, %v826_v63, %v2933_v20  ;;  %v881_v50 = vpack.c.bf16 %v842_v48, %v842_v48  ;;  %v2307_v54 = vld [vmem:[%s3269_s5 + $0x78] sm:$0xff]  }
 0x230   :  { %v726_v1 = vsel %vm675_vm8, %v2208_v42, %v2209_v14  ;;  %2041 = vmatpush3.bf16.msra.mxu1 %v2292_v51  ;;  %1185 = vmatprep.mubr.bf16.mxu1 %v879_v57  ;;  %v856_v27 = vsel %vm852_vm11, %v851_v0, %v810_v56  ;;  %v869_v20 = vsel %vm852_vm11, %v865_v24, %v2952_v31  ;;  %v2300_v31 = vld [vmem:[%s3268_s3 + $0x98] sm:$0xff]   ;;  %v2313_v56 = vld [vmem:[%s3269_s5 + $0x60] sm:$0xff]   ;;  %v2319_v0 = vld [vmem:[%s3269_s5 + $0x50] sm:$0xff]  }
 0x231   :  { %v801_v13 = vrot.slane %v726_v1, 6  ;;  %v2217_v52 = vpop.permute.xlu0 %2216  ;;  %2042 = vmatprep.subr.bf16.mxu1 %v2293_v55  ;;  %v861_v25 = vsel %vm857_vm12, %v856_v27, %v818_v61  ;;  %v2222_v30 = vpop.permute.xlu1 %2221  ;;  %v756_v4 = vsel %vm675_vm8, %v2213_v38, %v2214_v36  ;;  %2068 = vmatprep.subr.bf16.mxu0 %v2307_v54  ;;  %v2312_v55 = vld [vmem:[%s3269_s5 + $0x28] sm:$0xff]   ;;  %v2314_v14 = vld [vmem:[%s3269_s5 + $0x20] sm:$0xff]   ;;  %v2317_v42 = vld [vmem:[%s3269_s5 + $0xf8] sm:$0xff]  }
 0x232   :  { %v2219_v15 = vunpack.i.h.bf16 %v2217_v52  ;;  %v2218_v26 = vunpack.i.l.bf16 %v2217_v52  ;;  %v2224_v41 = vunpack.i.h.bf16 %v2222_v30  ;;  %v2223_v43 = vunpack.i.l.bf16 %v2222_v30  ;;  %v2318_v57 = vld [vmem:[%s3269_s5 + $0xb8] sm:$0xff]   ;;  %v2321_v1 = vld [vmem:[%s3269_s5 + $0xf0] sm:$0xff]   ;;  %v2323_v27 = vld [vmem:[%s3269_s5 + $0xe8] sm:$0xff]  }
 0x233   :  { %v850_v23 = vsel %vm847_vm10, %v2963_v39, %v801_v13  ;;  %v825_v21 = vrot.slane %v756_v4, 2  ;;  %v2315_v61 = vld [vmem:[%s3269_s5 + $0x58] sm:$0xff]   ;;  %v2324_v13 = vld [vmem:[%s3269_s5 + $0xa8] sm:$0xff]   ;;  %v2320_v52 = vld [vmem:[%s3269_s5 + $0x10] sm:$0xff]  }
 0x234   :  { %v855_v5 = vsel %vm852_vm11, %v850_v23, %v809_v59  ;;  %v798_v28 = vsel %vm675_vm8, %v2218_v26, %v2219_v15  ;;  %2043 = vmatpush3.bf16.msra.mxu1 %v2294_v12  ;;  %v792_v16 = vsel %vm675_vm8, %v2223_v43, %v2224_v41  ;;  %v2316_v63 = vld [vmem:[%s3269_s5 + $0x18] sm:$0xff]   ;;  %v2322_v12 = vld [vmem:[%s3269_s5 + $0xb0] sm:$0xff]   ;;  %v2328_v59 = vld [vmem:[%s3269_s5 + $0xa0] sm:$0xff]  }
 0x235   :  { %v834_v3 = vrot.slane %v798_v28, 6  ;;  %2044 = vmatprep.subr.bf16.mxu1 %v2295_v22  ;;  %v860_v39 = vsel %vm857_vm12, %v855_v5, %v817_v62  ;;  %v864_v60 = vsel %vm847_vm10, %v825_v21, %v2969_v40  ;;  %v833_v58 = vrot.slane %v792_v16, 6  ;;  %v2325_v22 = vld [vmem:[%s3269_s5 + $0x48] sm:$0xff]   ;;  %v2329_v15 = vld [vmem:[%s3269_s5 + $0xd8] sm:$0xff]   ;;  %v2331_v62 = vld [vmem:[%s3269_s5 + $0x40] sm:$0xff]  }
 0x236   :  { %v868_v47 = vsel %vm852_vm11, %v864_v60, %v2966_v44  ;;  %v841_v40 = vrot.slane %v2975_v37, 4  ;;  %v2308_v44 = vld [vmem:[%s3269_s5 + $0x38] sm:$0xff]   ;;  %v2310_v37 = vld [vmem:[%s3269_s5 + $0x30] sm:$0xff]   ;;  %v2332_v23 = vld [vmem:[%s3269_s5] sm:$0xff]  }
 0x237   :  { %1186 = vmatmul.mubr.bf16.gmra.mxu1 %v878_v53  ;;  %v873_v29 = vsel %vm857_vm12, %v869_v20, %v834_v3  ;;  %v872_v2 = vsel %vm857_vm12, %v868_v47, %v833_v58  ;;  %2069 = vmatpush3.bf16.msra.mxu0 %v2308_v44  ;;  %v2330_v26 = vld [vmem:[%s3269_s5 + $0x98] sm:$0xff]   ;;  %v2333_v24 = vld [vmem:[%s3269_s5 + $0xd0] sm:$0xff]   ;;  %v1867_v20 = vld [vmem:[%s3270_s4] ss:$0 sm:$0xff] }
 0x238   :  { %2045 = vmatpush3.bf16.msra.mxu1 %v2296_v32  ;;  %v877_v19 = vpack.c.bf16 %v873_v29, %v861_v25  ;;  %v876_v49 = vpack.c.bf16 %v872_v2, %v860_v39  ;;  %v880_v51 = vpack.c.bf16 %v841_v40, %v841_v40  ;;  %2070 = vmatprep.subr.bf16.mxu0 %v2309_v34  ;;  %v2326_v25 = vld [vmem:[%s3269_s5 + $0x8] sm:$0xff]   ;;  %v2334_v5 = vld [vmem:[%s3269_s5 + $0x90] sm:$0xff]   ;;  %v2339_v60 = vld [vmem:[%s3269_s5 + $0x80] sm:$0xff]  }
 0x239   :  { %2046 = vmatprep.subr.bf16.mxu1 %v2297_v9  ;;  %v2335_v4 = vld [vmem:[%s3269_s5 + $0xc8] sm:$0xff]  }
 0x23a   :  { %1225 = vmatprep.mubr.bf16.mxu1 %v877_v19  ;;  %v2336_v41 = vld [vmem:[%s3269_s5 + $0x88] sm:$0xff]  }
 0x23b   :  { %2071 = vmatpush3.bf16.msra.mxu0 %v2310_v37 }
 0x23c   :  { %2047 = vmatpush3.bf16.msra.mxu1 %v2298_v33  ;;  %2072 = vmatprep.subr.bf16.mxu0 %v2311_v7 }
 0x23d   :  { %2048 = vmatprep.subr.bf16.mxu1 %v2299_v17 }
 0x23f   :  { %2073 = vmatpush3.bf16.msra.mxu0 %v2312_v55 }
 0x240   :  { %2049 = vmatpush3.bf16.msra.mxu1 %v2300_v31  ;;  %2074 = vmatprep.subr.bf16.mxu0 %v2313_v56 }
 0x241   :  { %2050 = vmatprep.subr.bf16.mxu1 %v2301_v6 }
 0x243   :  { %2075 = vmatpush3.bf16.msra.mxu0 %v2314_v14 }
 0x244   :  { %2051 = vmatpush3.bf16.msra.mxu1 %v2302_v11  ;;  %2076 = vmatprep.subr.bf16.mxu0 %v2315_v61 }
 0x245   :  { %2052 = vmatprep.subr.bf16.mxu1 %v2303_v45 }
 0x247   :  { %2077 = vmatpush3.bf16.msra.mxu0 %v2316_v63 }
 0x248   :  { %2053 = vmatpush3.bf16.msra.mxu1 %v2304_v46  ;;  %2078 = vmatprep.subr.bf16.mxu0 %v2319_v0 }
 0x249   :  { %2054 = vmatprep.subr.bf16.mxu1 %v2305_v10  ;;  %v2337_v10 = vld [vmem:[%s3269_s5 + $0xc0] sm:$0xff]  }
 0x24b   :  { %2079 = vmatpush3.bf16.msra.mxu0 %v2320_v52 }
 0x24c   :  { %2055 = vmatpush3.bf16.msra.mxu1 %v2306_v18  ;;  %2080 = vmatprep.subr.bf16.mxu0 %v2325_v22  ;;  %v2358_v18 = vmov 0.0  }
 0x24d   :  { %2090 = vmatprep.subr.bf16.mxu1 %v2317_v42 }
 0x24f   :  { %1226 = vmatmul.mubr.bf16.vlgmr.msra.gmra.mxu1 %v876_v49  ;;  %2081 = vmatpush3.bf16.msra.mxu0 %v2326_v25 }
 0x250   :  { %1233 = vmatprep.mubr.bf16.mxu1 %v881_v50  ;;  %2091 = vmatpush3.bf16.msra.mxu1 %v2318_v57 }
 0x251   :  { %2092 = vmatprep.subr.bf16.mxu1 %v2321_v1  ;;  %2082 = vmatprep.subr.bf16.mxu0 %v2331_v62  ;;  %v2341_v62 = vld [vmem:[%s3269_s5 + $0x108] sm:$0xff]  }
 0x253   :  { %2083 = vmatpush3.bf16.msra.mxu0 %v2332_v23  ;;  %v2342_v23 = vld [vmem:[%s3269_s5 + $0x100] sm:$0xff]  }
 0x254   :  { %2093 = vmatpush3.bf16.msra.mxu1 %v2322_v12  ;;  %2117 = vmatprep.subr.bf16.mxu0 %v2358_v18 }
 0x255   :  { %2094 = vmatprep.subr.bf16.mxu1 %v2323_v27  ;;  %v2338_v27 = vld [vmem:[%s3269_s5 + $0x118] sm:$0xff]  }
 0x257   :  { %1234 = vmatmul.mubr.bf16.gmra.mxu1 %v880_v51 }
 0x258   :  { %2095 = vmatpush3.bf16.msra.mxu1 %v2324_v13 }
 0x259   :  { %2096 = vmatprep.subr.bf16.mxu1 %v2327_v35 }
 0x25c   :  { %2097 = vmatpush3.bf16.msra.mxu1 %v2328_v59 }
 0x25d   :  { %2098 = vmatprep.subr.bf16.mxu1 %v2329_v15 }
 0x260   :  { %2099 = vmatpush3.bf16.msra.mxu1 %v2330_v26  ;;  %v2340_v26 = vld [vmem:[%s3269_s5 + $0x110] sm:$0xff]  }
 0x261   :  { %2100 = vmatprep.subr.bf16.mxu1 %v2333_v24 }
 0x264   :  { %2101 = vmatpush3.bf16.msra.mxu1 %v2334_v5 }
 0x265   :  { %2102 = vmatprep.subr.bf16.mxu1 %v2335_v4  ;;  %v1900_v4 = vld [vmem:[%s3272_s6] ss:$0 sm:$0xff] }
 0x268   :  { %2103 = vmatpush3.bf16.msra.mxu1 %v2336_v41 }
 0x269   :  { %2104 = vmatprep.subr.bf16.mxu1 %v2337_v10 }
 0x26c   :  { %2105 = vmatpush3.bf16.msra.mxu1 %v2339_v60 }
 0x2ef   :  { %v2028_v28 = vpop.f32.mrf.mxu1 }
 0x2f1   :  { %v2029_v32 = vpop.f32.mrf.mxu1 }
 0x2f2   :  { %v2030_v17 = vadd.f32 %v2029_v32, %v2028_v28  ;;  %v2343_v28 = vld [vmem:[%s3271_s7 + $0x30] ss:$8 sps:$4 sm:$0xff]   ;;  %v2345_v32 = vld [vmem:[%s3271_s7 + $0x34] ss:$8 sps:$4 sm:$0xff]  }
 0x2f3   :  { %v2031_v3 = vpop.f32.mrf.mxu1  ;;  %1766 = vmatprep.subr.bf16.mxu1 %v2345_v32 }
 0x2f4   :  { %v1180_v30 = vadd.f32 %v2030_v17, %v1867_v20 }
 0x2f5   :  { %v2032_v53 = vpop.f32.mrf.mxu1 }
 0x2f6   :  { %v2033_v31 = vadd.f32 %v2032_v53, %v2031_v3  ;;  %v2348_v3 = vld [vmem:[%s3271_s7 + $0x24] ss:$8 sps:$4 sm:$0xff]   ;;  %v2346_v53 = vld [vmem:[%s3271_s7 + $0x20] ss:$8 sps:$4 sm:$0xff]  }
 0x2f7   :  { %v2034_v9 = vpop.f32.mrf.mxu1 }
 0x2f8   :  { %v1183_v21 = vadd.f32 %v2033_v31, %v1867_v20 }
 0x2f9   :  { %v2035_v39 = vpop.f32.mrf.mxu1 }
 0x2fa   :  { %v2036_v8 = vadd.f32 %v2035_v39, %v2034_v9  ;;  %v2351_v9 = vld [vmem:[%s3271_s7 + $0x14] ss:$8 sps:$4 sm:$0xff]   ;;  %v2349_v39 = vld [vmem:[%s3271_s7 + $0x10] ss:$8 sps:$4 sm:$0xff]  }
 0x2fb   :  { %v2037_v29 = vpop.f32.mrf.mxu1 }
 0x2fc   :  { %v1188_v19 = vadd.f32 %v2036_v8, %v1867_v20  ;;  %v2352_v8 = vld [vmem:[%s3271_s7] ss:$8 sps:$4 sm:$0xff]   ;;  %v2354_v20 = vld [vmem:[%s3271_s7 + $0x4] ss:$8 sps:$4 sm:$0xff]   ;;  %v2360_v29 = vmov 0  }
 0x2fd   :  { %v2038_v33 = vpop.f32.mrf.mxu1 }
 0x30f   :  { %v2056_v36 = vpop.f32.mrf.mxu1 }
 0x311   :  { %v2057_v38 = vpop.f32.mrf.mxu1 }
 0x312   :  { %v2058_v6 = vadd.f32 %v2057_v38, %v2056_v36 }
 0x313   :  { %v2059_v43 = vpop.f32.mrf.mxu1 }
 0x314   :  { %v1228_v11 = vadd.f32 %v2058_v6, %v1180_v30 }
 0x315   :  { %v2060_v45 = vpop.f32.mrf.mxu1 }
 0x316   :  { %v1241_v16 = vmax.f32 %v1228_v11, 0.0  ;;  %v2061_v46 = vadd.f32 %v2060_v45, %v2059_v43 }
 0x317   :  { %v2062_v58 = vpop.f32.mrf.mxu1 }
 0x318   :  { %v1231_v47 = vadd.f32 %v2061_v46, %v1183_v21  ;;  %v1245_v2 = vrot.slane %v1241_v16, 2  ;;  %v1251_v48 = vrot.slane %v1241_v16, 6  ;;  %v1249_v57 = vrot.slane %v1241_v16, 4 }
 0x319   :  { %v2063_v49 = vpop.f32.mrf.mxu1 }
 0x31a   :  { %v1242_v50 = vmax.f32 %v1231_v47, 0.0  ;;  %v2064_v40 = vadd.f32 %v2063_v49, %v2062_v58  ;;  %v2225_v51 = vpack.i.bf16 %v1245_v2, %v1251_v48  ;;  %v16_v47 = vstv %s3273_s10 }
 0x31b   :  { %v2065_v54 = vpop.f32.mrf.mxu1  ;;  %17 = vst [vmem:[#allocation2] sm:$0x1] %v16_v47  ;;  %v1705_v2 = vlaneseq }
 0x31c   :  { %v1236_v44 = vadd.f32 %v2064_v40, %v1188_v19  ;;  %2226 = vrot.lane.b32.xlu0 %v2225_v51, %s2355_s0  ;;  %v1256_v34 = vrot.slane %v1242_v50, 2  ;;  %v1262_v37 = vrot.slane %v1242_v50, 6  ;;  %v1260_v22 = vrot.slane %v1242_v50, 4  ;;  %v1801_v54 = vld [vmem:[%s3275_s9] sm:$0x3] }
 0x31d   :  { %v2066_v7 = vpop.f32.mrf.mxu1  ;;  %v1706_v48 = vshrl.u32 %v1705_v2, 7 }
 0x31e   :  { %v2230_v55 = vpack.i.bf16 %v1256_v34, %v1262_v37  ;;  %v1243_v24 = vmax.f32 %v1236_v44, 0.0 }
 0x31f   :  { %v1707_v49 = vsub.s32 0, %v1706_v48  ;;  %v1711_v40 = vsub.s32 1, %v1706_v48 }
 0x320   :  { %2231 = vrot.lane.b32.xlu1 %v2230_v55, %s2355_s0  ;;  %v1274_v5 = vpack.c.bf16 %v1243_v24, %v1243_v24 }
 0x321   :  { %v1806_v7 = vrot.slane %v1801_v54, %v1707_v49 }
 0x38e   :  { %v2227_v56 = vpop.permute.xlu0 %2226 }
 0x38f   :  { %v2229_v14 = vunpack.i.h.bf16 %v2227_v56  ;;  %v2228_v42 = vunpack.i.l.bf16 %v2227_v56 }
 0x391   :  { %v1266_v61 = vsel %vm675_vm8, %v1241_v16, %v2229_v14  ;;  %v1267_v63 = vsel %vm675_vm8, %v1249_v57, %v2228_v42  ;;  %v1810_v42 = vrot.slane %v1801_v54, %v1711_v40 }
 0x392   :  { %v1270_v0 = vpack.c.bf16 %v1266_v61, %v1266_v61  ;;  %v2232_v1 = vpop.permute.xlu1 %2231  ;;  %v1271_v12 = vpack.c.bf16 %v1267_v63, %v1267_v63 }
 0x393   :  { %v2234_v13 = vunpack.i.h.bf16 %v2232_v1  ;;  %v2233_v52 = vunpack.i.l.bf16 %v2232_v1 }
 0x394   :  { %1605 = vmatprep.mubr.bf16.mxu0 %v1271_v12 }
 0x395   :  { %v1268_v35 = vsel %vm675_vm8, %v1242_v50, %v2234_v13  ;;  %1606 = vmatmul.mubr.bf16.vlgmr.msra.gmra.mxu0 %v1270_v0  ;;  %v1269_v25 = vsel %vm675_vm8, %v1260_v22, %v2233_v52  ;;  %v1703_v50 = vld [vmem:[%s3274_s8] sm:$0x3] }
 0x396   :  { %v1272_v59 = vpack.c.bf16 %v1268_v35, %v1268_v35  ;;  %2118 = vmatpush3.bf16.msra.mxu0 %v2338_v27  ;;  %v1273_v15 = vpack.c.bf16 %v1269_v25, %v1269_v25  ;;  %2125 = vmatprep.mubr.msk.bf16.mxu0 %vm2359_vm13, %v2358_v18  ;;  %v1708_v51 = vrot.slane %v1703_v50, %v1707_v49  ;;  %v1947_v52 = vld [vmem:[#allocation2] ss:$0 sm:$0xff] }
 0x397   :  { %2119 = vmatprep.subr.bf16.mxu0 %v2358_v18  ;;  %v1712_v44 = vrot.slane %v1703_v50, %v1711_v40 }
 0x398   :  { %1645 = vmatprep.mubr.bf16.mxu1 %v1273_v15 }
 0x399   :  { %1646 = vmatmul.mubr.bf16.vlgmr.msra.gmra.mxu1 %v1272_v59 }
 0x39a   :  { %2120 = vmatpush3.bf16.msra.mxu0 %v2340_v26  ;;  %1767 = vmatpush1.bf16.msra.mxu1 %v2343_v28 }
 0x39b   :  { %2121 = vmatprep.subr.bf16.mxu0 %v2358_v18  ;;  %1768 = vmatprep.subr.bf16.mxu1 %v2348_v3 }
 0x39c   :  { %1790 = vmatprep.mubr.bf16.mxu1 %v2360_v29 }
 0x39e   :  { %2122 = vmatpush3.bf16.msra.mxu0 %v2341_v62  ;;  %1769 = vmatpush1.bf16.msra.mxu1 %v2346_v53 }
 0x39f   :  { %2123 = vmatprep.subr.bf16.mxu0 %v2358_v18  ;;  %1770 = vmatprep.subr.bf16.mxu1 %v2351_v9 }
 0x3a2   :  { %2124 = vmatpush3.bf16.msra.mxu0 %v2342_v23  ;;  %1771 = vmatpush1.bf16.msra.mxu1 %v2349_v39 }
 0x3a3   :  { %1772 = vmatprep.subr.bf16.mxu1 %v2354_v20 }
 0x3a5   :  { %2126 = vmatmul.mubr.msk.bf16.vlgmr.msra.gmra.mxu0 %vm675_vm8, %v1274_v5 }
 0x3a6   :  { %1773 = vmatpush1.bf16.msra.mxu1 %v2352_v8 }
 0x455   :  { %v2084_v19 = vpop.f32.mrf.mxu0 }
 0x457   :  { %v2085_v33 = vpop.f32.mrf.mxu0 }
 0x458   :  { %v2086_v6 = vadd.f32 %v2085_v33, %v2084_v19 }
 0x459   :  { %v2087_v17 = vpop.f32.mrf.mxu0  ;;  %v2106_v36 = vpop.f32.mrf.mxu1 }
 0x45a   :  { %v1608_v11 = vadd.f32 %v2086_v6, %v1900_v4 }
 0x45b   :  { %v2088_v38 = vpop.f32.mrf.mxu0  ;;  %v2107_v30 = vpop.f32.mrf.mxu1 }
 0x45c   :  { %v2108_v43 = vadd.f32 %v2107_v30, %v2106_v36 }
 0x45d   :  { %v2109_v31 = vpop.f32.mrf.mxu1 }
 0x45e   :  { %v1648_v45 = vadd.f32 %v2108_v43, %v1608_v11 }
 0x45f   :  { %v2110_v41 = vpop.f32.mrf.mxu1 }
 0x465   :  { %v1687_v21 = vpop.f32.mrf.mxu0 }
 0x466   :  { %v1688_v16 = vadd.f32 %v1687_v21, %v1648_v45 }
 0x467   :  { %v2127_v46 = vpop.f32.mrf.mxu0 }
 0x468   :  { %v1693_v10 = vmax.f32 %v1688_v16, 0.0 }
 0x469   :  { %v1690_v60 = vpop.f32.mrf.mxu0 }
 0x46a   :  { %v1694_v58 = vpack.c.bf16 %v1693_v10, %v1693_v10 }
 0x46b   :  { %v2128_v18 = vpop.f32.mrf.mxu0 }
 0x46c   :  { %1946 = vmatmul.mubr.msk.bf16.vlgmr.msra.gmra.mxu1 %vm675_vm8, %v1694_v58 }
 0x52c   :  { %v1792_v34 = vpop.f32.mrf.mxu1 }
 0x52d   :  { %v1793_v37 = vadd.f32 %v1792_v34, %v1708_v51 }
 0x52e   :  { %v1794_v55 = vpop.f32.mrf.mxu1 }
 0x52f   :  { %v1799_v56 = vmax.f32 %v1793_v37, 0.0  ;;  %v1795_v14 = vadd.f32 %v1794_v55, %v1712_v44 }
 0x530   :  { %v1796_v57 = vpop.f32.mrf.mxu1 }
 0x531   :  { %v1813_v61 = vmul.f32 %v1806_v7, %v1799_v56  ;;  %v1800_v63 = vmax.f32 %v1795_v14, 0.0 }
 0x532   :  { %v1797_v0 = vpop.f32.mrf.mxu1 }
 0x533   :  { %v1814_v1 = vmul.f32 %v1810_v42, %v1800_v63  ;;  %v1815_v12 = vsel %vm847_vm10, %v1813_v61, 0.0 }
 0x535   :  { %v1816_v27 = vsel %vm847_vm10, %v1814_v1, 0.0 }
 0x536   :  { %v1817_v13 = vadd.f32 %v1816_v27, %v1815_v12 }
 0x538   :  { %1818 = vadd.xlane.f32.xlu0 %v1817_v13 }
 0x5c1   :  { %v1819_v22 = vpop.xlane.xlu0 %1818 }
 0x5c2   :  { %v1827_v35 = vadd.f32 %v1947_v52, %v1819_v22 }
 0x5c4   :  { %1829 = vst.msk [vmem:[%s3276_s11] sm:$0x3] %vm1828_vm14, %v1827_v35 }

</bundles_post_ra>
